<compile_context>
chip_gen: v5e
topology: v5e:2x2
jax: 0.10.0
libtpu: 0.0.40
codegen_flags: <defaults>
</compile_context>

<pallas_src>
import functools

import jax
import jax.numpy as jnp
from jax.experimental import pallas as pl
from jax.experimental.pallas import tpu as pltpu

# (in_features, out_features) for each Linear in the Sequential.
LAYER_DIMS = [(3, 16), (16, 32), (32, 32), (32, 64), (64, 64), (64, 64),
              (64, 32), (32, 16), (16, 2)]
NUM_LAYERS = len(LAYER_DIMS)

IN_FEATURES = LAYER_DIMS[0][0]     # 3
OUT_FEATURES = LAYER_DIMS[-1][1]   # 2
IN_PAD = 8                         # layer-0 fan-in padded to 8 inside the kernel

# Per-layer matmul shapes used inside the kernel. Only layer 0's fan-in is
# padded (3 -> 8); the padded weight rows are zero so the math is exact.
PIN = [IN_PAD, 16, 32, 32, 64, 64, 64, 32, 16]
POUT = [16, 32, 32, 64, 64, 64, 32, 16, OUT_FEATURES]

W_SLOT_R, W_SLOT_C = 64, 128       # each layer's weights live in a (64,128) slot

CHUNK_B = 256                      # rows per in-kernel compute chunk (no spills)
MAX_BLOCK_B = 1024                 # rows per grid step (4 chunks)


def _round_up(n, m):
    return ((n + m - 1) // m) * m


def _pick_block_b(batch):
    """~1024-row blocks, but keep >=2 grid steps (megacore) when batch allows."""
    if batch <= CHUNK_B:
        return CHUNK_B
    return min(MAX_BLOCK_B, _round_up(pl.cdiv(batch, 2), CHUNK_B))


def fnn_kernel(x_ref, w_ref, b_ref, o_ref, xpad_ref, *, n_chunks):
    """One batch block (n_chunks * CHUNK_B rows) through the whole 9-layer MLP.

    x_ref:    (BLOCK_B, 3)      f32 raw input features
    w_ref:    (9, 64, 128)      bf16 packed weight slab (resident across steps)
    b_ref:    (9, 1, 128)       f32  packed bias slab   (resident across steps)
    o_ref:    (BLOCK_B, 2)      f32 output
    xpad_ref: (CHUNK_B, 128)    f32 scratch: zero-padded layer-0 input chunk
    """
    # Zero the padded-input scratch once per grid step; lanes >= IN_FEATURES
    # stay zero across chunks, so the K=8 first-layer matmul is exact.
    xpad_ref[...] = jnp.zeros_like(xpad_ref)

    def chunk_body(c, carry):
        r = pl.multiple_of(c * CHUNK_B, CHUNK_B)
        xpad_ref[:, :IN_FEATURES] = x_ref[pl.ds(r, CHUNK_B), :]
        h = xpad_ref[:, :IN_PAD]                 # (CHUNK_B, 8) f32, cols 3..7 == 0
        for i in range(NUM_LAYERS):
            pin, pout = PIN[i], POUT[i]
            w = w_ref[i, :pin, :pout]            # bf16 static slice of resident slab
            b = b_ref[i, :, :pout]               # f32 (1, pout), broadcasts over rows
            h = jnp.dot(h.astype(jnp.bfloat16), w,
                        preferred_element_type=jnp.float32) + b
            if i != NUM_LAYERS - 1:              # ReLU on all but the last layer
                h = jnp.maximum(h, 0.0)
        o_ref[pl.ds(r, CHUNK_B), :] = h.astype(o_ref.dtype)
        return carry

    jax.lax.fori_loop(0, n_chunks, chunk_body, 0)


def init_params(key, dtype=jnp.float32):
    """PyTorch-default-style init: U(-1/sqrt(fan_in), 1/sqrt(fan_in))."""
    weights, biases = [], []
    for (fan_in, fan_out) in LAYER_DIMS:
        key, kw, kb = jax.random.split(key, 3)
        bound = 1.0 / jnp.sqrt(jnp.asarray(fan_in, dtype=jnp.float32))
        weights.append(jax.random.uniform(kw, (fan_in, fan_out), dtype, -bound, bound))
        biases.append(jax.random.uniform(kb, (fan_out,), dtype, -bound, bound))
    return weights, biases


def pack_params(weights, biases):
    """Pack 9 weights (bf16) / 9 biases (f32) into zero-padded contiguous slabs."""
    w_packed = jnp.zeros((NUM_LAYERS, W_SLOT_R, W_SLOT_C), jnp.bfloat16)
    b_packed = jnp.zeros((NUM_LAYERS, 1, W_SLOT_C), jnp.float32)
    for i, ((fan_in, fan_out), w, b) in enumerate(zip(LAYER_DIMS, weights, biases)):
        w_packed = w_packed.at[i, :fan_in, :fan_out].set(w.astype(jnp.bfloat16))
        b_packed = b_packed.at[i, 0, :fan_out].set(
            b.reshape(fan_out).astype(jnp.float32))
    return w_packed, b_packed


@jax.jit
def fnn_forward(x, w_packed, b_packed):
    batch = x.shape[0]
    block_b = _pick_block_b(batch)
    n_chunks = block_b // CHUNK_B
    grid = (pl.cdiv(batch, block_b),)

    kernel = functools.partial(fnn_kernel, n_chunks=n_chunks)
    return pl.pallas_call(
        kernel,
        out_shape=jax.ShapeDtypeStruct((batch, OUT_FEATURES), jnp.float32),
        grid=grid,
        in_specs=[
            pl.BlockSpec((block_b, IN_FEATURES), lambda i: (i, 0)),          # x block
            pl.BlockSpec((NUM_LAYERS, W_SLOT_R, W_SLOT_C),
                         lambda i: (0, 0, 0)),                               # weights (resident)
            pl.BlockSpec((NUM_LAYERS, 1, W_SLOT_C),
                         lambda i: (0, 0, 0)),                               # biases (resident)
        ],
        out_specs=pl.BlockSpec((block_b, OUT_FEATURES), lambda i: (i, 0)),
        scratch_shapes=[pltpu.VMEM((CHUNK_B, 128), jnp.float32)],
        compiler_params=pltpu.CompilerParams(
            dimension_semantics=("parallel",)),
    )(x.astype(jnp.float32), w_packed, b_packed)


def reference_forward(x, weights, biases):
    """Pure-f32 reference matching the PyTorch module's forward."""
    h = x.astype(jnp.float32)
    for i, (w, b) in enumerate(zip(weights, biases)):
        h = h @ w.astype(jnp.float32) + b.astype(jnp.float32)
        if i != NUM_LAYERS - 1:
            h = jnp.maximum(h, 0.0)
    return h


if __name__ == "__main__":
    key = jax.random.PRNGKey(0)
    key, kx1, kx2 = jax.random.split(key, 3)

    weights, biases = init_params(key, dtype=jnp.float32)
    w_packed, b_packed = pack_params(weights, biases)

    # batch=300: 2 grid steps of 256 rows (single chunk, ragged tail).
    # batch=2500: 3 grid steps of 1024 rows, 4 chunks per step, ragged tail.
    for kx, batch in ((kx1, 300), (kx2, 2500)):
        x = jax.random.normal(kx, (batch, IN_FEATURES), dtype=jnp.float32)
        out = fnn_forward(x, w_packed, b_packed)
        jax.block_until_ready(out)

        ref = reference_forward(x, weights, biases)
        assert out.shape == (batch, OUT_FEATURES), out.shape
        # bf16 matmul operands -> allow a few % drift vs. the f32 reference.
        scale = float(jnp.max(jnp.abs(ref)))
        err = float(jnp.max(jnp.abs(out - ref)))
        assert err <= 5e-2 * scale + 1e-5, (batch, err, scale)

    print("KERNEL_OK")
</pallas_src>

<mosaic_0001>
module attributes {stable_mosaic.version = 11 : i64} {
  func.func @fnn_kernel(%arg0: i32, %arg1: memref<256x3xf32, #tpu.memory_space<vmem>>, %arg2: memref<9x64x128xbf16, #tpu.memory_space<vmem>>, %arg3: memref<9x1x128xf32, #tpu.memory_space<vmem>>, %arg4: memref<256x2xf32, #tpu.memory_space<vmem>>, %arg5: memref<256x128xf32, #tpu.memory_space<vmem>>) attributes {dimension_semantics = [#tpu.dimension_semantics<parallel>], iteration_bounds = array<i64: 2>, scalar_prefetch = 0 : i64, scratch_operands = 1 : i64, tpu.core_type = #tpu.core_type<tc>, window_params = [{transform_indices = @transform_0, window_bounds = array<i64: 256, 3>}, {pipeline_mode = #tpu.pipeline_mode<synchronous>, transform_indices = @transform_1, window_bounds = array<i64: 9, 64, 128>}, {pipeline_mode = #tpu.pipeline_mode<synchronous>, transform_indices = @transform_2, window_bounds = array<i64: 9, 1, 128>}, {transform_indices = @transform_3, window_bounds = array<i64: 256, 2>}]} {
    %cst = arith.constant 0.000000e+00 : f32
    %0 = vector.broadcast %cst : f32 to vector<256x128xf32>
    %c0 = arith.constant 0 : index
    %c0_0 = arith.constant 0 : index
    %1 = vector.load %arg5[%c0, %c0_0] : memref<256x128xf32, #tpu.memory_space<vmem>>, vector<256x128xf32>
    tpu.vector_store %arg5[%c0, %c0_0], %0 {strides = array<i32>} : memref<256x128xf32, #tpu.memory_space<vmem>>, vector<256x128xf32>,
    %c0_i32 = arith.constant 0 : i32
    %c256_i32 = arith.constant 256 : i32
    %2 = arith.muli %c0_i32, %c256_i32 : i32
    %3 = tpu.assume_multiple %2, 256 : i32
    %4 = arith.index_cast %3 : i32 to index
    %c0_1 = arith.constant 0 : index
    %5 = vector.load %arg1[%4, %c0_1] : memref<256x3xf32, #tpu.memory_space<vmem>>, vector<256x3xf32>
    %c0_2 = arith.constant 0 : index
    %c0_3 = arith.constant 0 : index
    %6 = vector.load %arg5[%c0_2, %c0_3] : memref<256x128xf32, #tpu.memory_space<vmem>>, vector<256x3xf32>
    tpu.vector_store %arg5[%c0_2, %c0_3], %5 {strides = array<i32>} : memref<256x128xf32, #tpu.memory_space<vmem>>, vector<256x3xf32>,
    %c0_4 = arith.constant 0 : index
    %c0_5 = arith.constant 0 : index
    %7 = vector.load %arg5[%c0_4, %c0_5] : memref<256x128xf32, #tpu.memory_space<vmem>>, vector<256x8xf32>
    %c0_6 = arith.constant 0 : index
    %c0_7 = arith.constant 0 : index
    %c0_8 = arith.constant 0 : index
    %8 = vector.load %arg2[%c0_6, %c0_7, %c0_8] : memref<9x64x128xbf16, #tpu.memory_space<vmem>>, vector<1x8x16xbf16>
    %9 = vector.shape_cast %8 : vector<1x8x16xbf16> to vector<8x16xbf16>
    %c0_9 = arith.constant 0 : index
    %c0_10 = arith.constant 0 : index
    %c0_11 = arith.constant 0 : index
    %10 = vector.load %arg3[%c0_9, %c0_10, %c0_11] : memref<9x1x128xf32, #tpu.memory_space<vmem>>, vector<1x1x16xf32>
    %11 = vector.shape_cast %10 : vector<1x1x16xf32> to vector<1x16xf32>
    %12 = arith.truncf %7 : vector<256x8xf32> to vector<256x8xbf16>
    %cst_12 = arith.constant dense<0.000000e+00> : vector<256x16xf32>
    %13 = tpu.matmul %12, %9, %cst_12 {dimension_numbers = #tpu.dot_dimension_numbers<[1], [0], [0], [1], [0, 0, 1, 1], [], []>} : vector<256x8xbf16>, vector<8x16xbf16>, vector<256x16xf32> -> vector<256x16xf32>
    %14 = vector.broadcast %11 : vector<1x16xf32> to vector<256x16xf32>
    %15 = arith.addf %13, %14 : vector<256x16xf32>
    %cst_13 = arith.constant 0.000000e+00 : f32
    %16 = vector.broadcast %cst_13 : f32 to vector<256x16xf32>
    %17 = arith.maximumf %15, %16 : vector<256x16xf32>
    %c1 = arith.constant 1 : index
    %c0_14 = arith.constant 0 : index
    %c0_15 = arith.constant 0 : index
    %18 = vector.load %arg2[%c1, %c0_14, %c0_15] : memref<9x64x128xbf16, #tpu.memory_space<vmem>>, vector<1x16x32xbf16>
    %19 = vector.shape_cast %18 : vector<1x16x32xbf16> to vector<16x32xbf16>
    %c1_16 = arith.constant 1 : index
    %c0_17 = arith.constant 0 : index
    %c0_18 = arith.constant 0 : index
    %20 = vector.load %arg3[%c1_16, %c0_17, %c0_18] : memref<9x1x128xf32, #tpu.memory_space<vmem>>, vector<1x1x32xf32>
    %21 = vector.shape_cast %20 : vector<1x1x32xf32> to vector<1x32xf32>
    %22 = arith.truncf %17 : vector<256x16xf32> to vector<256x16xbf16>
    %cst_19 = arith.constant dense<0.000000e+00> : vector<256x32xf32>
    %23 = tpu.matmul %22, %19, %cst_19 {dimension_numbers = #tpu.dot_dimension_numbers<[1], [0], [0], [1], [0, 0, 1, 1], [], []>} : vector<256x16xbf16>, vector<16x32xbf16>, vector<256x32xf32> -> vector<256x32xf32>
    %24 = vector.broadcast %21 : vector<1x32xf32> to vector<256x32xf32>
    %25 = arith.addf %23, %24 : vector<256x32xf32>
    %cst_20 = arith.constant 0.000000e+00 : f32
    %26 = vector.broadcast %cst_20 : f32 to vector<256x32xf32>
    %27 = arith.maximumf %25, %26 : vector<256x32xf32>
    %c2 = arith.constant 2 : index
    %c0_21 = arith.constant 0 : index
    %c0_22 = arith.constant 0 : index
    %28 = vector.load %arg2[%c2, %c0_21, %c0_22] : memref<9x64x128xbf16, #tpu.memory_space<vmem>>, vector<1x32x32xbf16>
    %29 = vector.shape_cast %28 : vector<1x32x32xbf16> to vector<32x32xbf16>
    %c2_23 = arith.constant 2 : index
    %c0_24 = arith.constant 0 : index
    %c0_25 = arith.constant 0 : index
    %30 = vector.load %arg3[%c2_23, %c0_24, %c0_25] : memref<9x1x128xf32, #tpu.memory_space<vmem>>, vector<1x1x32xf32>
    %31 = vector.shape_cast %30 : vector<1x1x32xf32> to vector<1x32xf32>
    %32 = arith.truncf %27 : vector<256x32xf32> to vector<256x32xbf16>
    %cst_26 = arith.constant dense<0.000000e+00> : vector<256x32xf32>
    %33 = tpu.matmul %32, %29, %cst_26 {dimension_numbers = #tpu.dot_dimension_numbers<[1], [0], [0], [1], [0, 0, 1, 1], [], []>} : vector<256x32xbf16>, vector<32x32xbf16>, vector<256x32xf32> -> vector<256x32xf32>
    %34 = vector.broadcast %31 : vector<1x32xf32> to vector<256x32xf32>
    %35 = arith.addf %33, %34 : vector<256x32xf32>
    %cst_27 = arith.constant 0.000000e+00 : f32
    %36 = vector.broadcast %cst_27 : f32 to vector<256x32xf32>
    %37 = arith.maximumf %35, %36 : vector<256x32xf32>
    %c3 = arith.constant 3 : index
    %c0_28 = arith.constant 0 : index
    %c0_29 = arith.constant 0 : index
    %38 = vector.load %arg2[%c3, %c0_28, %c0_29] : memref<9x64x128xbf16, #tpu.memory_space<vmem>>, vector<1x32x64xbf16>
    %39 = vector.shape_cast %38 : vector<1x32x64xbf16> to vector<32x64xbf16>
    %c3_30 = arith.constant 3 : index
    %c0_31 = arith.constant 0 : index
    %c0_32 = arith.constant 0 : index
    %40 = vector.load %arg3[%c3_30, %c0_31, %c0_32] : memref<9x1x128xf32, #tpu.memory_space<vmem>>, vector<1x1x64xf32>
    %41 = vector.shape_cast %40 : vector<1x1x64xf32> to vector<1x64xf32>
    %42 = arith.truncf %37 : vector<256x32xf32> to vector<256x32xbf16>
    %cst_33 = arith.constant dense<0.000000e+00> : vector<256x64xf32>
    %43 = tpu.matmul %42, %39, %cst_33 {dimension_numbers = #tpu.dot_dimension_numbers<[1], [0], [0], [1], [0, 0, 1, 1], [], []>} : vector<256x32xbf16>, vector<32x64xbf16>, vector<256x64xf32> -> vector<256x64xf32>
    %44 = vector.broadcast %41 : vector<1x64xf32> to vector<256x64xf32>
    %45 = arith.addf %43, %44 : vector<256x64xf32>
    %cst_34 = arith.constant 0.000000e+00 : f32
    %46 = vector.broadcast %cst_34 : f32 to vector<256x64xf32>
    %47 = arith.maximumf %45, %46 : vector<256x64xf32>
    %c4 = arith.constant 4 : index
    %c0_35 = arith.constant 0 : index
    %c0_36 = arith.constant 0 : index
    %48 = vector.load %arg2[%c4, %c0_35, %c0_36] : memref<9x64x128xbf16, #tpu.memory_space<vmem>>, vector<1x64x64xbf16>
    %49 = vector.shape_cast %48 : vector<1x64x64xbf16> to vector<64x64xbf16>
    %c4_37 = arith.constant 4 : index
    %c0_38 = arith.constant 0 : index
    %c0_39 = arith.constant 0 : index
    %50 = vector.load %arg3[%c4_37, %c0_38, %c0_39] : memref<9x1x128xf32, #tpu.memory_space<vmem>>, vector<1x1x64xf32>
    %51 = vector.shape_cast %50 : vector<1x1x64xf32> to vector<1x64xf32>
    %52 = arith.truncf %47 : vector<256x64xf32> to vector<256x64xbf16>
    %cst_40 = arith.constant dense<0.000000e+00> : vector<256x64xf32>
    %53 = tpu.matmul %52, %49, %cst_40 {dimension_numbers = #tpu.dot_dimension_numbers<[1], [0], [0], [1], [0, 0, 1, 1], [], []>} : vector<256x64xbf16>, vector<64x64xbf16>, vector<256x64xf32> -> vector<256x64xf32>
    %54 = vector.broadcast %51 : vector<1x64xf32> to vector<256x64xf32>
    %55 = arith.addf %53, %54 : vector<256x64xf32>
    %cst_41 = arith.constant 0.000000e+00 : f32
    %56 = vector.broadcast %cst_41 : f32 to vector<256x64xf32>
    %57 = arith.maximumf %55, %56 : vector<256x64xf32>
    %c5 = arith.constant 5 : index
    %c0_42 = arith.constant 0 : index
    %c0_43 = arith.constant 0 : index
    %58 = vector.load %arg2[%c5, %c0_42, %c0_43] : memref<9x64x128xbf16, #tpu.memory_space<vmem>>, vector<1x64x64xbf16>
    %59 = vector.shape_cast %58 : vector<1x64x64xbf16> to vector<64x64xbf16>
    %c5_44 = arith.constant 5 : index
    %c0_45 = arith.constant 0 : index
    %c0_46 = arith.constant 0 : index
    %60 = vector.load %arg3[%c5_44, %c0_45, %c0_46] : memref<9x1x128xf32, #tpu.memory_space<vmem>>, vector<1x1x64xf32>
    %61 = vector.shape_cast %60 : vector<1x1x64xf32> to vector<1x64xf32>
    %62 = arith.truncf %57 : vector<256x64xf32> to vector<256x64xbf16>
    %cst_47 = arith.constant dense<0.000000e+00> : vector<256x64xf32>
    %63 = tpu.matmul %62, %59, %cst_47 {dimension_numbers = #tpu.dot_dimension_numbers<[1], [0], [0], [1], [0, 0, 1, 1], [], []>} : vector<256x64xbf16>, vector<64x64xbf16>, vector<256x64xf32> -> vector<256x64xf32>
    %64 = vector.broadcast %61 : vector<1x64xf32> to vector<256x64xf32>
    %65 = arith.addf %63, %64 : vector<256x64xf32>
    %cst_48 = arith.constant 0.000000e+00 : f32
    %66 = vector.broadcast %cst_48 : f32 to vector<256x64xf32>
    %67 = arith.maximumf %65, %66 : vector<256x64xf32>
    %c6 = arith.constant 6 : index
    %c0_49 = arith.constant 0 : index
    %c0_50 = arith.constant 0 : index
    %68 = vector.load %arg2[%c6, %c0_49, %c0_50] : memref<9x64x128xbf16, #tpu.memory_space<vmem>>, vector<1x64x32xbf16>
    %69 = vector.shape_cast %68 : vector<1x64x32xbf16> to vector<64x32xbf16>
    %c6_51 = arith.constant 6 : index
    %c0_52 = arith.constant 0 : index
    %c0_53 = arith.constant 0 : index
    %70 = vector.load %arg3[%c6_51, %c0_52, %c0_53] : memref<9x1x128xf32, #tpu.memory_space<vmem>>, vector<1x1x32xf32>
    %71 = vector.shape_cast %70 : vector<1x1x32xf32> to vector<1x32xf32>
    %72 = arith.truncf %67 : vector<256x64xf32> to vector<256x64xbf16>
    %cst_54 = arith.constant dense<0.000000e+00> : vector<256x32xf32>
    %73 = tpu.matmul %72, %69, %cst_54 {dimension_numbers = #tpu.dot_dimension_numbers<[1], [0], [0], [1], [0, 0, 1, 1], [], []>} : vector<256x64xbf16>, vector<64x32xbf16>, vector<256x32xf32> -> vector<256x32xf32>
    %74 = vector.broadcast %71 : vector<1x32xf32> to vector<256x32xf32>
    %75 = arith.addf %73, %74 : vector<256x32xf32>
    %cst_55 = arith.constant 0.000000e+00 : f32
    %76 = vector.broadcast %cst_55 : f32 to vector<256x32xf32>
    %77 = arith.maximumf %75, %76 : vector<256x32xf32>
    %c7 = arith.constant 7 : index
    %c0_56 = arith.constant 0 : index
    %c0_57 = arith.constant 0 : index
    %78 = vector.load %arg2[%c7, %c0_56, %c0_57] : memref<9x64x128xbf16, #tpu.memory_space<vmem>>, vector<1x32x16xbf16>
    %79 = vector.shape_cast %78 : vector<1x32x16xbf16> to vector<32x16xbf16>
    %c7_58 = arith.constant 7 : index
    %c0_59 = arith.constant 0 : index
    %c0_60 = arith.constant 0 : index
    %80 = vector.load %arg3[%c7_58, %c0_59, %c0_60] : memref<9x1x128xf32, #tpu.memory_space<vmem>>, vector<1x1x16xf32>
    %81 = vector.shape_cast %80 : vector<1x1x16xf32> to vector<1x16xf32>
    %82 = arith.truncf %77 : vector<256x32xf32> to vector<256x32xbf16>
    %cst_61 = arith.constant dense<0.000000e+00> : vector<256x16xf32>
    %83 = tpu.matmul %82, %79, %cst_61 {dimension_numbers = #tpu.dot_dimension_numbers<[1], [0], [0], [1], [0, 0, 1, 1], [], []>} : vector<256x32xbf16>, vector<32x16xbf16>, vector<256x16xf32> -> vector<256x16xf32>
    %84 = vector.broadcast %81 : vector<1x16xf32> to vector<256x16xf32>
    %85 = arith.addf %83, %84 : vector<256x16xf32>
    %cst_62 = arith.constant 0.000000e+00 : f32
    %86 = vector.broadcast %cst_62 : f32 to vector<256x16xf32>
    %87 = arith.maximumf %85, %86 : vector<256x16xf32>
    %c8 = arith.constant 8 : index
    %c0_63 = arith.constant 0 : index
    %c0_64 = arith.constant 0 : index
    %88 = vector.load %arg2[%c8, %c0_63, %c0_64] : memref<9x64x128xbf16, #tpu.memory_space<vmem>>, vector<1x16x2xbf16>
    %89 = vector.shape_cast %88 : vector<1x16x2xbf16> to vector<16x2xbf16>
    %c8_65 = arith.constant 8 : index
    %c0_66 = arith.constant 0 : index
    %c0_67 = arith.constant 0 : index
    %90 = vector.load %arg3[%c8_65, %c0_66, %c0_67] : memref<9x1x128xf32, #tpu.memory_space<vmem>>, vector<1x1x2xf32>
    %91 = vector.shape_cast %90 : vector<1x1x2xf32> to vector<1x2xf32>
    %92 = arith.truncf %87 : vector<256x16xf32> to vector<256x16xbf16>
    %cst_68 = arith.constant dense<0.000000e+00> : vector<256x2xf32>
    %93 = tpu.matmul %92, %89, %cst_68 {dimension_numbers = #tpu.dot_dimension_numbers<[1], [0], [0], [1], [0, 0, 1, 1], [], []>} : vector<256x16xbf16>, vector<16x2xbf16>, vector<256x2xf32> -> vector<256x2xf32>
    %94 = vector.broadcast %91 : vector<1x2xf32> to vector<256x2xf32>
    %95 = arith.addf %93, %94 : vector<256x2xf32>
    %96 = arith.index_cast %3 : i32 to index
    %c0_69 = arith.constant 0 : index
    %97 = vector.load %arg4[%96, %c0_69] : memref<256x2xf32, #tpu.memory_space<vmem>>, vector<256x2xf32>
    tpu.vector_store %arg4[%96, %c0_69], %95 {strides = array<i32>} : memref<256x2xf32, #tpu.memory_space<vmem>>, vector<256x2xf32>,
    %c1_i32 = arith.constant 1 : i32
    return
  }
  func.func @transform_0(%arg0: i32) -> (i32, i32) {
    %c0_i32 = arith.constant 0 : i32
    %c0_i32_0 = arith.constant 0 : i32
    return %arg0, %c0_i32 : i32, i32
  }
  func.func @transform_1(%arg0: i32) -> (i32, i32, i32) {
    %c0_i32 = arith.constant 0 : i32
    %c0_i32_0 = arith.constant 0 : i32
    %c0_i32_1 = arith.constant 0 : i32
    %c0_i32_2 = arith.constant 0 : i32
    return %c0_i32, %c0_i32_0, %c0_i32_1 : i32, i32, i32
  }
  func.func @transform_2(%arg0: i32) -> (i32, i32, i32) {
    %c0_i32 = arith.constant 0 : i32
    %c0_i32_0 = arith.constant 0 : i32
    %c0_i32_1 = arith.constant 0 : i32
    %c0_i32_2 = arith.constant 0 : i32
    return %c0_i32, %c0_i32_0, %c0_i32_1 : i32, i32, i32
  }
  func.func @transform_3(%arg0: i32) -> (i32, i32) {
    %c0_i32 = arith.constant 0 : i32
    %c0_i32_0 = arith.constant 0 : i32
    return %arg0, %c0_i32 : i32, i32
  }
}

</mosaic_0001>

<bundles_post_ra>
// kernel: fnn_forward.1
= control target key start
LH: loop header
LB: loop body
LE: loop exit
PB: predicated region body
PF: predicated region fallthrough
CT: control target
= control target key end

     0   :  { %s3078_s12 = smov 0   ;;  %s3080_s13 = smov 0   ;;  %s3930_s0 = inlined_call_operand.vmem [shape: f32[300,3], index: 0, kind: input, shape index: {}]   ;;  %s3931_s1 = inlined_call_operand.vmem [shape: bf16[9,64,128], index: 1, kind: input, shape index: {}]   ;;  %s3932_s2 = inlined_call_operand.vmem [shape: f32[9,1,128], index: 2, kind: input, shape index: {}]   ;;  %s3933_s3 = inlined_call_operand.vmem [shape: f32[300,2], index: 3, kind: output, shape index: {}]  }
   0x1   :  { %s3082_s14 = smov 0  }
   0x2 LB: > { %s3091_s15 = sadd.s32 4294967295, %s3023_s14   ;;  %s3093_s16 = sadd.s32 1, %s3023_s14   ;;  %s3023_s14 = sphi %s3082_s14, %s3942_s14   ;;  %s3019_s13 = sphi %s3080_s13, %s3941_s13   ;;  %s3015_s12 = sphi %s3078_s12, %s3940_s12  }
   0x3   : > { %s85_s17 = ssub.s32 %s3023_s14, %s3093_s16  ;;  %s88_s18 = sadd.s32 1, %s3019_s13 }
   0x4   : > { %p86_p0 = scmp.eq.s32.totalorder %s85_s17, 0  ;;  %p98_p1 = scmp.ne.s32.totalorder %s3019_s13, %s3015_s12 }
   0x5   : > { %p99_p2 = scmp.eq.s32.totalorder %s3091_s15, 1  ;;  %p2552_p3 = scmp.ge.s32.totalorder %s3023_s14, 1 }
   0x6   : > { %s3101_s19 = scalar_select %p86_p0, %s3019_s13, %s88_s18  }
   0x7   : > { %p3103_p4 = por %p99_p2, %p98_p1  ;;  %p146_p5 = scmp.lt.s32.totalorder %s3023_s14, 3 }
   0x9   : > { %p147_p6 = pnand %p2552_p3, %p146_p5 }
   0xa   : > { %s3111_s23 = sshll.u32 (!%p147_p6), %s3091_s15, 5 }
   0xb   : > { %150 = sbr.rel (%p147_p6) target bundleno = 1631 (0x65f), region = 32  ;;  %p178_p7 = scmp.lt.s32.totalorder (!%p147_p6), %s3111_s23, 37 }
  0x10   : > { %v322_v0 = vld [vmem:[%s3931_s1] sm:$0xf]  ;;  %vm392_vm0 = vcmask 1043456   ;;  %v3057_v2 = vmov 0.0   ;;  %s179_s24 = scalar_select %p178_p7, %s3111_s23, 37  ;;  %vm257_vm1 = vcmask 23552  }
  0x11   : > { %v394_v1 = vsel %vm392_vm0, %v322_v0, 0  ;;  %193 = vst [vmem:[#allocation2] sm:$0xff] %v3057_v2  ;;  %vm343_vm2 = vcmask 64512   ;;  %v2845_v21 = vld [vmem:[%s3931_s1 + $0x20] sm:$0xff]  ;;  %vm547_vm3 = vcmask 130048   ;;  %vm755_vm4 = vcmask 261120  }
  0x12   : > { %403 = vmatpush.bf16.msra.mxu0 %v394_v1  ;;  %194 = vst [vmem:[#allocation2 + $0x8] sm:$0xff] %v3057_v2  ;;  %2868 = vmatpush.bf16.msra.mxu1 %v394_v1  ;;  %s2555_s25 = sshll.u32 %s179_s24, 3  ;;  %v3181_v60 = vld [vmem:[%s3932_s2] ss:$0 sm:$0xff]  ;;  %vm1186_vm5 = vcmask 523264   ;;  %vm2176_vm6 = vcmask 15360  }
  0x13   : > { %195 = vst [vmem:[#allocation2 + $0x10] sm:$0xff] %v3057_v2  ;;  %2869 = vmatpush.bf16.msra.mxu2 %v394_v1  ;;  %2870 = vmatpush.bf16.msra.mxu3 %v394_v1  ;;  %s3118_s28 = scalar_lea.vmem %s3930_s0, %s2555_s25  ;;  %s170_s25 = sand.u32 1, %s3015_s12  }
  0x14   : > { %196 = vst [vmem:[#allocation2 + $0x18] sm:$0xff] %v3057_v2  ;;  %v225_v3 = vld [vmem:[%s3118_s28] sm:$0xff]  ;;  %v226_v4 = vld [vmem:[%s3118_s28 + $0x8] sm:$0xff]  ;;  %v227_v8 = vld [vmem:[%s3118_s28 + $0x10] sm:$0xff]  ;;  %s2553_s26 = sshll.u32 %s170_s25, 8  ;;  %s2217_s12 = ssub.s32 (%p3103_p4), 38, %s3111_s23 }
  0x15   : > { %197 = vst [vmem:[#allocation2 + $0x20] sm:$0xff] %v3057_v2  ;;  %v228_v9 = vld [vmem:[%s3118_s28 + $0x18] sm:$0xff]  ;;  %v229_v10 = vld [vmem:[%s3118_s28 + $0x20] sm:$0xff]  ;;  %v230_v11 = vld [vmem:[%s3118_s28 + $0x28] sm:$0xff]  ;;  %s3667_s29 = scalar_lea.vmem [#allocation3], %s2553_s26   ;;  %s2865_s30 = sshll.u32 (%p3103_p4), %s3091_s15, 8 }
  0x16   : > { %198 = vst [vmem:[#allocation2 + $0x28] sm:$0xff] %v3057_v2  ;;  %v231_v12 = vld [vmem:[%s3118_s28 + $0x30] sm:$0xff]  ;;  %v232_v13 = vld [vmem:[%s3118_s28 + $0x38] sm:$0xff]  ;;  %v233_v16 = vld [vmem:[%s3118_s28 + $0x40] sm:$0xff]  ;;  %603 = vmatpush.bf16.msrb.mxu1 %v2845_v21  ;;  %p2218_p8 = scmp.lt.s32.totalorder (%p3103_p4), %s2217_s12, 32  ;;  %s3795_s6 = scalar_lea.vmem (%p3103_p4), %s3933_s3, %s2865_s30  }
  0x17   : > { %199 = vst [vmem:[#allocation2 + $0x30] sm:$0xff] %v3057_v2  ;;  %v234_v17 = vld [vmem:[%s3118_s28 + $0x48] sm:$0xff]  ;;  %v235_v19 = vld [vmem:[%s3118_s28 + $0x50] sm:$0xff]  ;;  %v236_v20 = vld [vmem:[%s3118_s28 + $0x58] sm:$0xff] }
  0x18   : > { %258 = vst.msk [vmem:[#allocation2] sm:$0xff] %vm257_vm1, %v225_v3  ;;  %v237_v22 = vld [vmem:[%s3118_s28 + $0x60] sm:$0xff]  ;;  %v238_v23 = vld [vmem:[%s3118_s28 + $0x68] sm:$0xff]  ;;  %v239_v29 = vld [vmem:[%s3118_s28 + $0x70] sm:$0xff] }
  0x19   : > { %259 = vst.msk [vmem:[#allocation2 + $0x8] sm:$0xff] %vm257_vm1, %v226_v4  ;;  %v240_v30 = vld [vmem:[%s3118_s28 + $0x78] sm:$0xff]  ;;  %v241_v37 = vld [vmem:[%s3118_s28 + $0x80] sm:$0xff]  ;;  %v242_v38 = vld [vmem:[%s3118_s28 + $0x88] sm:$0xff] }
  0x1a   : > { %200 = vst [vmem:[#allocation2 + $0x38] sm:$0xff] %v3057_v2  ;;  %v243_v49 = vld [vmem:[%s3118_s28 + $0x90] sm:$0xff]  ;;  %v244_v50 = vld [vmem:[%s3118_s28 + $0x98] sm:$0xff]  ;;  %v245_v54 = vld [vmem:[%s3118_s28 + $0xa0] sm:$0xff] }
  0x1b   : > { %201 = vst [vmem:[#allocation2 + $0x40] sm:$0xff] %v3057_v2  ;;  %v246_v55 = vld [vmem:[%s3118_s28 + $0xa8] sm:$0xff]  ;;  %v247_v61 = vld [vmem:[%s3118_s28 + $0xb0] sm:$0xff]  ;;  %v248_v62 = vld [vmem:[%s3118_s28 + $0xb8] sm:$0xff] }
  0x1c   : > { %202 = vst [vmem:[#allocation2 + $0x48] sm:$0xff] %v3057_v2 }
  0x1d   : > { %203 = vst [vmem:[#allocation2 + $0x50] sm:$0xff] %v3057_v2 }
  0x1e   : > { %204 = vst [vmem:[#allocation2 + $0x58] sm:$0xff] %v3057_v2 }
  0x1f   : > { %v290_v5 = vld [vmem:[#allocation2] sm:$0xff]  ;;  %205 = vst [vmem:[#allocation2 + $0x60] sm:$0xff] %v3057_v2 }
  0x20   : > { %v291_v6 = vld [vmem:[#allocation2 + $0x8] sm:$0xff]  ;;  %206 = vst [vmem:[#allocation2 + $0x68] sm:$0xff] %v3057_v2 }
  0x21   : > { %v324_v7 = vpack.c.bf16 %v291_v6, %v290_v5  ;;  %207 = vst [vmem:[#allocation2 + $0x70] sm:$0xff] %v3057_v2 }
  0x22   : > { %208 = vst [vmem:[#allocation2 + $0x78] sm:$0xff] %v3057_v2 }
  0x23   : > { %2556 = vmatmul.msk.bf16.vlgmr.msra.gmra.mxu0 %vm343_vm2, %v324_v7  ;;  %209 = vst [vmem:[#allocation2 + $0x80] sm:$0xff] %v3057_v2 }
  0x24   : > { %210 = vst [vmem:[#allocation2 + $0x88] sm:$0xff] %v3057_v2 }
  0x25   : > { %211 = vst [vmem:[#allocation2 + $0x90] sm:$0xff] %v3057_v2 }
  0x26   : > { %212 = vst [vmem:[#allocation2 + $0x98] sm:$0xff] %v3057_v2 }
  0x27   : > { %213 = vst [vmem:[#allocation2 + $0xa0] sm:$0xff] %v3057_v2 }
  0x28   : > { %214 = vst [vmem:[#allocation2 + $0xa8] sm:$0xff] %v3057_v2 }
  0x29   : > { %215 = vst [vmem:[#allocation2 + $0xb0] sm:$0xff] %v3057_v2 }
  0x2a   : > { %216 = vst [vmem:[#allocation2 + $0xb8] sm:$0xff] %v3057_v2 }
  0x2b   : > { %217 = vst [vmem:[#allocation2 + $0xc0] sm:$0xff] %v3057_v2 }
  0x2c   : > { %218 = vst [vmem:[#allocation2 + $0xc8] sm:$0xff] %v3057_v2 }
  0x2d   : > { %219 = vst [vmem:[#allocation2 + $0xd0] sm:$0xff] %v3057_v2 }
  0x2e   : > { %220 = vst [vmem:[#allocation2 + $0xd8] sm:$0xff] %v3057_v2 }
  0x2f   : > { %221 = vst [vmem:[#allocation2 + $0xe0] sm:$0xff] %v3057_v2 }
  0x30   : > { %222 = vst [vmem:[#allocation2 + $0xe8] sm:$0xff] %v3057_v2 }
  0x31   : > { %223 = vst [vmem:[#allocation2 + $0xf0] sm:$0xff] %v3057_v2 }
  0x32   : > { %224 = vst [vmem:[#allocation2 + $0xf8] sm:$0xff] %v3057_v2 }
  0x33   : > { %260 = vst.msk [vmem:[#allocation2 + $0x10] sm:$0xff] %vm257_vm1, %v227_v8  ;;  %v249_v8 = vld [vmem:[%s3118_s28 + $0xc0] sm:$0xff] }
  0x34   : > { %261 = vst.msk [vmem:[#allocation2 + $0x18] sm:$0xff] %vm257_vm1, %v228_v9  ;;  %v250_v9 = vld [vmem:[%s3118_s28 + $0xc8] sm:$0xff] }
  0x35   : > { %262 = vst.msk [vmem:[#allocation2 + $0x20] sm:$0xff] %vm257_vm1, %v229_v10 }
  0x36   : > { %263 = vst.msk [vmem:[#allocation2 + $0x28] sm:$0xff] %vm257_vm1, %v230_v11 }
  0x37   : > { %264 = vst.msk [vmem:[#allocation2 + $0x30] sm:$0xff] %vm257_vm1, %v231_v12 }
  0x38   : > { %265 = vst.msk [vmem:[#allocation2 + $0x38] sm:$0xff] %vm257_vm1, %v232_v13 }
  0x39   : > { %266 = vst.msk [vmem:[#allocation2 + $0x40] sm:$0xff] %vm257_vm1, %v233_v16 }
  0x3a   : > { %v292_v14 = vld [vmem:[#allocation2 + $0x10] sm:$0xff]  ;;  %267 = vst.msk [vmem:[#allocation2 + $0x48] sm:$0xff] %vm257_vm1, %v234_v17 }
  0x3b   : > { %v293_v15 = vld [vmem:[#allocation2 + $0x18] sm:$0xff]  ;;  %268 = vst.msk [vmem:[#allocation2 + $0x50] sm:$0xff] %vm257_vm1, %v235_v19  ;;  %v251_v17 = vld [vmem:[%s3118_s28 + $0xd0] sm:$0xff] }
  0x3c   : > { %v325_v18 = vpack.c.bf16 %v293_v15, %v292_v14  ;;  %269 = vst.msk [vmem:[#allocation2 + $0x58] sm:$0xff] %vm257_vm1, %v236_v20  ;;  %v294_v27 = vld [vmem:[#allocation2 + $0x20] sm:$0xff] }
  0x3d   : > { %270 = vst.msk [vmem:[#allocation2 + $0x60] sm:$0xff] %vm257_vm1, %v237_v22  ;;  %v295_v28 = vld [vmem:[#allocation2 + $0x28] sm:$0xff] }
  0x3e   : > { %2557 = vmatmul.msk.bf16.gmra.mxu0 %vm343_vm2, %v325_v18  ;;  %271 = vst.msk [vmem:[#allocation2 + $0x68] sm:$0xff] %vm257_vm1, %v238_v23  ;;  %v326_v31 = vpack.c.bf16 %v295_v28, %v294_v27  ;;  %v296_v35 = vld [vmem:[#allocation2 + $0x30] sm:$0xff]  ;;  %v252_v18 = vld [vmem:[%s3118_s28 + $0xd8] sm:$0xff] }
  0x3f   : > { %272 = vst.msk [vmem:[#allocation2 + $0x70] sm:$0xff] %vm257_vm1, %v239_v29  ;;  %v297_v36 = vld [vmem:[#allocation2 + $0x38] sm:$0xff]  ;;  %v253_v29 = vld [vmem:[%s3118_s28 + $0xe0] sm:$0xff] }
  0x40   : > { %v298_v24 = vld [vmem:[#allocation2 + $0x40] sm:$0xff]  ;;  %273 = vst.msk [vmem:[#allocation2 + $0x78] sm:$0xff] %vm257_vm1, %v240_v30  ;;  %v327_v39 = vpack.c.bf16 %v297_v36, %v296_v35  ;;  %v254_v30 = vld [vmem:[%s3118_s28 + $0xe8] sm:$0xff] }
  0x41   : > { %v299_v25 = vld [vmem:[#allocation2 + $0x48] sm:$0xff]  ;;  %274 = vst.msk [vmem:[#allocation2 + $0x80] sm:$0xff] %vm257_vm1, %v241_v37 }
  0x42   : > { %v328_v26 = vpack.c.bf16 %v299_v25, %v298_v24  ;;  %v300_v32 = vld [vmem:[#allocation2 + $0x50] sm:$0xff]  ;;  %275 = vst.msk [vmem:[#allocation2 + $0x88] sm:$0xff] %vm257_vm1, %v242_v38  ;;  %v2847_v35 = vld [vmem:[%s3931_s1 + $0x48] sm:$0xff] }
  0x43   : > { %v301_v33 = vld [vmem:[#allocation2 + $0x58] sm:$0xff]  ;;  %276 = vst.msk [vmem:[#allocation2 + $0x90] sm:$0xff] %vm257_vm1, %v243_v49  ;;  %810 = vmatpush.bf16.msrb.mxu2 %v2847_v35 }
  0x44   : > { %2560 = vmatmul.msk.bf16.vlgmr.msra.gmra.mxu1 %vm343_vm2, %v328_v26  ;;  %v329_v34 = vpack.c.bf16 %v301_v33, %v300_v32  ;;  %v302_v41 = vld [vmem:[#allocation2 + $0x60] sm:$0xff]  ;;  %277 = vst.msk [vmem:[#allocation2 + $0x98] sm:$0xff] %vm257_vm1, %v244_v50 }
  0x45   : > { %v303_v42 = vld [vmem:[#allocation2 + $0x68] sm:$0xff]  ;;  %278 = vst.msk [vmem:[#allocation2 + $0xa0] sm:$0xff] %vm257_vm1, %v245_v54 }
  0x46   : > { %v330_v45 = vpack.c.bf16 %v303_v42, %v302_v41  ;;  %v304_v46 = vld [vmem:[#allocation2 + $0x70] sm:$0xff]  ;;  %279 = vst.msk [vmem:[#allocation2 + $0xa8] sm:$0xff] %vm257_vm1, %v246_v55 }
  0x47   : > { %v305_v47 = vld [vmem:[#allocation2 + $0x78] sm:$0xff]  ;;  %280 = vst.msk [vmem:[#allocation2 + $0xb0] sm:$0xff] %vm257_vm1, %v247_v61 }
  0x48   : > { %v306_v40 = vld [vmem:[#allocation2 + $0x80] sm:$0xff]  ;;  %v331_v48 = vpack.c.bf16 %v305_v47, %v304_v46  ;;  %281 = vst.msk [vmem:[#allocation2 + $0xb8] sm:$0xff] %vm257_vm1, %v248_v62 }
  0x49   : > { %v307_v43 = vld [vmem:[#allocation2 + $0x88] sm:$0xff]  ;;  %282 = vst.msk [vmem:[#allocation2 + $0xc0] sm:$0xff] %vm257_vm1, %v249_v8 }
  0x4a   : > { %v332_v44 = vpack.c.bf16 %v307_v43, %v306_v40  ;;  %v308_v51 = vld [vmem:[#allocation2 + $0x90] sm:$0xff]  ;;  %283 = vst.msk [vmem:[#allocation2 + $0xc8] sm:$0xff] %vm257_vm1, %v250_v9 }
  0x4b   : > { %v309_v52 = vld [vmem:[#allocation2 + $0x98] sm:$0xff]  ;;  %284 = vst.msk [vmem:[#allocation2 + $0xd0] sm:$0xff] %vm257_vm1, %v251_v17 }
  0x4c   : > { %2564 = vmatmul.msk.bf16.vlgmr.msra.gmra.mxu2 %vm343_vm2, %v332_v44  ;;  %v333_v53 = vpack.c.bf16 %v309_v52, %v308_v51  ;;  %v310_v56 = vld [vmem:[#allocation2 + $0xa0] sm:$0xff]  ;;  %285 = vst.msk [vmem:[#allocation2 + $0xd8] sm:$0xff] %vm257_vm1, %v252_v18  ;;  %v255_v44 = vld [vmem:[%s3118_s28 + $0xf0] sm:$0xff] }
  0x4d   : > { %v311_v57 = vld [vmem:[#allocation2 + $0xa8] sm:$0xff]  ;;  %286 = vst.msk [vmem:[#allocation2 + $0xe0] sm:$0xff] %vm257_vm1, %v253_v29 }
  0x4e   : > { %2558 = vmatmul.msk.bf16.gmra.mxu0 %vm343_vm2, %v326_v31  ;;  %v334_v58 = vpack.c.bf16 %v311_v57, %v310_v56  ;;  %v312_v5 = vld [vmem:[#allocation2 + $0xb0] sm:$0xff]  ;;  %287 = vst.msk [vmem:[#allocation2 + $0xe8] sm:$0xff] %vm257_vm1, %v254_v30 }
  0x4f   : > { %v313_v6 = vld [vmem:[#allocation2 + $0xb8] sm:$0xff]  ;;  %288 = vst.msk [vmem:[#allocation2 + $0xf0] sm:$0xff] %vm257_vm1, %v255_v44 }
  0x50   : > { %v335_v7 = vpack.c.bf16 %v313_v6, %v312_v5  ;;  %v314_v11 = vld [vmem:[#allocation2 + $0xc0] sm:$0xff] }
  0x51   : > { %v315_v12 = vld [vmem:[#allocation2 + $0xc8] sm:$0xff] }
  0x52   : > { %v336_v13 = vpack.c.bf16 %v315_v12, %v314_v11  ;;  %v316_v23 = vld [vmem:[#allocation2 + $0xd0] sm:$0xff] }
  0x53   : > { %v317_v24 = vld [vmem:[#allocation2 + $0xd8] sm:$0xff] }
  0x54   : > { %2561 = vmatmul.msk.bf16.gmra.mxu1 %vm343_vm2, %v329_v34  ;;  %2568 = vmatmul.msk.bf16.vlgmr.msra.gmra.mxu3 %vm343_vm2, %v336_v13  ;;  %v337_v25 = vpack.c.bf16 %v317_v24, %v316_v23  ;;  %v318_v37 = vld [vmem:[#allocation2 + $0xe0] sm:$0xff] }
  0x55   : > { %v319_v38 = vld [vmem:[#allocation2 + $0xe8] sm:$0xff] }
  0x56   : > { %v320_v50 = vld [vmem:[#allocation2 + $0xf0] sm:$0xff] }
  0x5c   : > { %2565 = vmatmul.msk.bf16.gmra.mxu2 %vm343_vm2, %v333_v53 }
  0x5e   : > { %2559 = vmatmul.msk.bf16.gmra.mxu0 %vm343_vm2, %v327_v39  ;;  %v338_v39 = vpack.c.bf16 %v319_v38, %v318_v37 }
  0x64   : > { %2562 = vmatmul.msk.bf16.gmra.mxu1 %vm343_vm2, %v330_v45  ;;  %2569 = vmatmul.msk.bf16.gmra.mxu3 %vm343_vm2, %v337_v25  ;;  %v256_v45 = vld [vmem:[%s3118_s28 + $0xf8] sm:$0xff] }
  0x65   : > { %289 = vst.msk [vmem:[#allocation2 + $0xf8] sm:$0xff] %vm257_vm1, %v256_v45 }
  0x6c   : > { %2566 = vmatmul.msk.bf16.gmra.mxu2 %vm343_vm2, %v334_v58  ;;  %v321_v51 = vld [vmem:[#allocation2 + $0xf8] sm:$0xff] }
  0x6d   : > { %v339_v52 = vpack.c.bf16 %v321_v51, %v320_v50 }
  0x74   : > { %2563 = vmatmul.msk.bf16.gmra.mxu1 %vm343_vm2, %v331_v48  ;;  %2570 = vmatmul.msk.bf16.gmra.mxu3 %vm343_vm2, %v338_v39 }
  0x7c   : > { %2567 = vmatmul.msk.bf16.gmra.mxu2 %vm343_vm2, %v335_v7 }
  0x84   : > { %2571 = vmatmul.msk.bf16.gmra.mxu3 %vm343_vm2, %v339_v52 }
  0xa0   : > { %v405_v59 = vpop.f32.mrf.mxu0 }
  0xa1   : > { %v406_v63 = vadd.f32 %v3181_v60, %v405_v59  ;;  %v2846_v59 = vld [vmem:[%s3931_s1 + $0x40] sm:$0xff] }
  0xa2   : > { %811 = vmatpush.bf16.msrb.mxu2 %v2846_v59 }
  0xa3   : > { %v485_v2 = vmax.f32 %v406_v63, 0.0 }
  0xa8   : > { %v407_v0 = vpop.f32.mrf.mxu0 }
  0xa9   : > { %v408_v1 = vadd.f32 %v3181_v60, %v407_v0 }
  0xab   : > { %v486_v3 = vmax.f32 %v408_v1, 0.0 }
  0xad   : > { %v522_v4 = vpack.c.bf16 %v486_v3, %v485_v2 }
  0xaf   : > { %2579 = vmatmul.msk.bf16.vlgmr.msrb.gmra.mxu1 %vm547_vm3, %v522_v4 }
  0xbb   : > { %v410_v10 = vpop.f32.mrf.mxu0 }
  0xbc   : > { %v411_v14 = vadd.f32 %v3181_v60, %v410_v10 }
  0xbe   : > { %v487_v19 = vmax.f32 %v411_v14, 0.0 }
  0xc1   : > { %v425_v33 = vpop.f32.mrf.mxu1 }
  0xc2   : > { %v426_v53 = vadd.f32 %v3181_v60, %v425_v33 }
  0xc3   : > { %v412_v15 = vpop.f32.mrf.mxu0 }
  0xc4   : > { %v413_v16 = vadd.f32 %v3181_v60, %v412_v15  ;;  %v493_v55 = vmax.f32 %v426_v53, 0.0 }
  0xc6   : > { %v488_v20 = vmax.f32 %v413_v16, 0.0 }
  0xc8   : > { %v523_v21 = vpack.c.bf16 %v488_v20, %v487_v19  ;;  %v3241_v20 = vld [vmem:[%s3932_s2 + $0x1] ss:$0 sm:$0xff] }
  0xc9   : > { %v427_v40 = vpop.f32.mrf.mxu1 }
  0xca   : > { %2580 = vmatmul.msk.bf16.gmra.mxu1 %vm547_vm3, %v523_v21  ;;  %v428_v54 = vadd.f32 %v3181_v60, %v427_v40 }
  0xcb   : > { %v415_v22 = vpop.f32.mrf.mxu0 }
  0xcc   : > { %v416_v26 = vadd.f32 %v3181_v60, %v415_v22  ;;  %v494_v56 = vmax.f32 %v428_v54, 0.0 }
  0xce   : > { %v489_v31 = vmax.f32 %v416_v26, 0.0  ;;  %v526_v58 = vpack.c.bf16 %v494_v56, %v493_v55 }
  0xcf   : > { %v445_v9 = vpop.f32.mrf.mxu2 }
  0xd0   : > { %v446_v21 = vadd.f32 %v3181_v60, %v445_v9 }
  0xd1   : > { %v430_v49 = vpop.f32.mrf.mxu1 }
  0xd2   : > { %v431_v62 = vadd.f32 %v3181_v60, %v430_v49  ;;  %v501_v24 = vmax.f32 %v446_v21, 0.0  ;;  %v2849_v21 = vld [vmem:[%s3931_s1 + $0x68] sm:$0xff] }
  0xd3   : > { %v417_v27 = vpop.f32.mrf.mxu0  ;;  %1017 = vmatpush.bf16.msrb.mxu3 %v2849_v21 }
  0xd4   : > { %v418_v28 = vadd.f32 %v3181_v60, %v417_v27  ;;  %v495_v0 = vmax.f32 %v431_v62, 0.0 }
  0xd6   : > { %v490_v32 = vmax.f32 %v418_v28, 0.0 }
  0xd7   : > { %v447_v14 = vpop.f32.mrf.mxu2  ;;  %v465_v53 = vpop.f32.mrf.mxu3 }
  0xd8   : > { %v524_v34 = vpack.c.bf16 %v490_v32, %v489_v31  ;;  %v448_v22 = vadd.f32 %v3181_v60, %v447_v14  ;;  %v466_v9 = vadd.f32 %v3181_v60, %v465_v53 }
  0xd9   : > { %v432_v57 = vpop.f32.mrf.mxu1 }
  0xda   : > { %2581 = vmatmul.msk.bf16.gmra.mxu1 %vm547_vm3, %v524_v34  ;;  %v433_v63 = vadd.f32 %v3181_v60, %v432_v57  ;;  %v502_v25 = vmax.f32 %v448_v22, 0.0  ;;  %v509_v14 = vmax.f32 %v466_v9, 0.0 }
  0xdb   : > { %v420_v36 = vpop.f32.mrf.mxu0 }
  0xdc   : > { %v421_v41 = vadd.f32 %v3181_v60, %v420_v36  ;;  %v496_v1 = vmax.f32 %v433_v63, 0.0  ;;  %v530_v31 = vpack.c.bf16 %v502_v25, %v501_v24 }
  0xde   : > { %v491_v46 = vmax.f32 %v421_v41, 0.0  ;;  %v527_v2 = vpack.c.bf16 %v496_v1, %v495_v0 }
  0xdf   : > { %v450_v18 = vpop.f32.mrf.mxu2  ;;  %v467_v62 = vpop.f32.mrf.mxu3 }
  0xe0   : > { %v451_v34 = vadd.f32 %v3181_v60, %v450_v18 }
  0xe1   : > { %v435_v61 = vpop.f32.mrf.mxu1 }
  0xe2   : > { %v436_v4 = vadd.f32 %v3181_v60, %v435_v61  ;;  %v503_v36 = vmax.f32 %v451_v34, 0.0 }
  0xe3   : > { %v422_v42 = vpop.f32.mrf.mxu0 }
  0xe4   : > { %v423_v43 = vadd.f32 %v3181_v60, %v422_v42  ;;  %v497_v7 = vmax.f32 %v436_v4, 0.0 }
  0xe6   : > { %v492_v47 = vmax.f32 %v423_v43, 0.0 }
  0xe7   : > { %v452_v27 = vpop.f32.mrf.mxu2 }
  0xe8   : > { %v525_v48 = vpack.c.bf16 %v492_v47, %v491_v46  ;;  %v453_v35 = vadd.f32 %v3181_v60, %v452_v27 }
  0xe9   : > { %v437_v3 = vpop.f32.mrf.mxu1 }
  0xea   : > { %2582 = vmatmul.msk.bf16.gmra.mxu1 %vm547_vm3, %v525_v48  ;;  %v438_v5 = vadd.f32 %v3181_v60, %v437_v3  ;;  %v504_v37 = vmax.f32 %v453_v35, 0.0 }
  0xec   : > { %v498_v8 = vmax.f32 %v438_v5, 0.0  ;;  %v531_v39 = vpack.c.bf16 %v504_v37, %v503_v36 }
  0xee   : > { %v528_v10 = vpack.c.bf16 %v498_v8, %v497_v7 }
  0xef   : > { %v455_v33 = vpop.f32.mrf.mxu2 }
  0xf0   : > { %v456_v43 = vadd.f32 %v3181_v60, %v455_v33 }
  0xf1   : > { %v440_v6 = vpop.f32.mrf.mxu1 }
  0xf2   : > { %v441_v12 = vadd.f32 %v3181_v60, %v440_v6  ;;  %v505_v49 = vmax.f32 %v456_v43, 0.0  ;;  %v470_v6 = vpop.f32.mrf.mxu3 }
  0xf3   : > { %v471_v25 = vadd.f32 %v3181_v60, %v470_v6 }
  0xf4   : > { %v499_v15 = vmax.f32 %v441_v12, 0.0 }
  0xf7   : > { %v457_v40 = vpop.f32.mrf.mxu2 }
  0xf8   : > { %v458_v44 = vadd.f32 %v3181_v60, %v457_v40 }
  0xf9   : > { %v442_v11 = vpop.f32.mrf.mxu1 }
  0xfa   : > { %2583 = vmatmul.msk.bf16.gmra.mxu1 %vm547_vm3, %v526_v58  ;;  %v443_v13 = vadd.f32 %v3181_v60, %v442_v11  ;;  %v506_v50 = vmax.f32 %v458_v44, 0.0 }
  0xfc   : > { %v500_v16 = vmax.f32 %v443_v13, 0.0  ;;  %v532_v54 = vpack.c.bf16 %v506_v50, %v505_v49  ;;  %v2848_v49 = vld [vmem:[%s3931_s1 + $0x60] sm:$0xff] }
  0xfd   : > { %1018 = vmatpush.bf16.msrb.mxu3 %v2848_v49 }
  0xfe   : > { %v529_v17 = vpack.c.bf16 %v500_v16, %v499_v15 }
  0xff   : > { %v460_v48 = vpop.f32.mrf.mxu2 }
 0x100   : > { %v461_v58 = vadd.f32 %v3181_v60, %v460_v48 }
 0x102   : > { %v507_v1 = vmax.f32 %v461_v58, 0.0 }
 0x107   : > { %v462_v55 = vpop.f32.mrf.mxu2 }
 0x108   : > { %v463_v59 = vadd.f32 %v3181_v60, %v462_v55 }
 0x10a   : > { %2584 = vmatmul.msk.bf16.gmra.mxu1 %vm547_vm3, %v527_v2  ;;  %v508_v2 = vmax.f32 %v463_v59, 0.0 }
 0x10c   : > { %v533_v5 = vpack.c.bf16 %v508_v2, %v507_v1 }
 0x11a   : > { %2585 = vmatmul.msk.bf16.gmra.mxu1 %vm547_vm3, %v528_v10  ;;  %v468_v10 = vadd.f32 %v3181_v60, %v467_v62 }
 0x11c   : > { %v510_v15 = vmax.f32 %v468_v10, 0.0  ;;  %v3302_v10 = vld [vmem:[%s3932_s2 + $0x2] ss:$0 sm:$0xff] }
 0x12a   : > { %2586 = vmatmul.msk.bf16.gmra.mxu1 %vm547_vm3, %v529_v17  ;;  %v472_v17 = vpop.f32.mrf.mxu3 }
 0x12c   : > { %v605_v19 = vpop.f32.mrf.mxu1 }
 0x12d   : > { %v606_v23 = vadd.f32 %v3241_v20, %v605_v19  ;;  %v534_v19 = vpack.c.bf16 %v510_v15, %v509_v14 }
 0x12f   : > { %v685_v29 = vmax.f32 %v606_v23, 0.0 }
 0x132   : > { %v475_v24 = vpop.f32.mrf.mxu3 }
 0x134   : > { %v607_v26 = vpop.f32.mrf.mxu1 }
 0x135   : > { %v608_v28 = vadd.f32 %v3241_v20, %v607_v26  ;;  %v473_v26 = vadd.f32 %v3181_v60, %v472_v17 }
 0x137   : > { %v686_v30 = vmax.f32 %v608_v28, 0.0 }
 0x139   : > { %v724_v32 = vpack.c.bf16 %v686_v30, %v685_v29  ;;  %v511_v30 = vmax.f32 %v471_v25, 0.0 }
 0x13a   : > { %2587 = vmatmul.msk.bf16.gmra.mxu1 %vm547_vm3, %v530_v31  ;;  %v512_v31 = vmax.f32 %v473_v26, 0.0  ;;  %v477_v35 = vpop.f32.mrf.mxu3 }
 0x13b   : > { %2608 = vmatmul.msk.bf16.vlgmr.msrb.gmra.mxu2 %vm755_vm4, %v724_v32 }
 0x13c   : > { %v535_v34 = vpack.c.bf16 %v512_v31, %v511_v30 }
 0x142   : > { %v480_v43 = vpop.f32.mrf.mxu3 }
 0x143   : > { %v481_v53 = vadd.f32 %v3181_v60, %v480_v43 }
 0x145   : > { %v515_v58 = vmax.f32 %v481_v53, 0.0 }
 0x147   : > { %v610_v38 = vpop.f32.mrf.mxu1 }
 0x148   : > { %v611_v41 = vadd.f32 %v3241_v20, %v610_v38  ;;  %v476_v38 = vadd.f32 %v3181_v60, %v475_v24 }
 0x14a   : > { %2588 = vmatmul.msk.bf16.gmra.mxu1 %vm547_vm3, %v531_v39  ;;  %v687_v46 = vmax.f32 %v611_v41, 0.0  ;;  %v478_v39 = vadd.f32 %v3181_v60, %v477_v35  ;;  %v513_v44 = vmax.f32 %v476_v38, 0.0  ;;  %v482_v50 = vpop.f32.mrf.mxu3 }
 0x14f   : > { %v612_v42 = vpop.f32.mrf.mxu1 }
 0x150   : > { %v613_v45 = vadd.f32 %v3241_v20, %v612_v42 }
 0x152   : > { %v688_v47 = vmax.f32 %v613_v45, 0.0  ;;  %v514_v45 = vmax.f32 %v478_v39, 0.0 }
 0x154   : > { %v725_v51 = vpack.c.bf16 %v688_v47, %v687_v46  ;;  %v536_v48 = vpack.c.bf16 %v514_v45, %v513_v44 }
 0x156   : > { %2609 = vmatmul.msk.bf16.gmra.mxu2 %vm755_vm4, %v725_v51 }
 0x157   : > { %v615_v52 = vpop.f32.mrf.mxu1 }
 0x158   : > { %v616_v56 = vadd.f32 %v3241_v20, %v615_v52 }
 0x15a   : > { %2589 = vmatmul.msk.bf16.gmra.mxu1 %vm547_vm3, %v532_v54  ;;  %v689_v63 = vmax.f32 %v616_v56, 0.0  ;;  %v483_v54 = vadd.f32 %v3181_v60, %v482_v50 }
 0x15c   : > { %v516_v59 = vmax.f32 %v483_v54, 0.0 }
 0x15f   : > { %v617_v57 = vpop.f32.mrf.mxu1 }
 0x160   : > { %v618_v61 = vadd.f32 %v3241_v20, %v617_v57 }
 0x162   : > { %v690_v0 = vmax.f32 %v618_v61, 0.0 }
 0x164   : > { %v726_v3 = vpack.c.bf16 %v690_v0, %v689_v63  ;;  %v537_v63 = vpack.c.bf16 %v516_v59, %v515_v58 }
 0x166   : > { %2610 = vmatmul.msk.bf16.gmra.mxu2 %vm755_vm4, %v726_v3 }
 0x167   : > { %v620_v4 = vpop.f32.mrf.mxu1 }
 0x168   : > { %v621_v7 = vadd.f32 %v3241_v20, %v620_v4 }
 0x16a   : > { %2590 = vmatmul.msk.bf16.gmra.mxu1 %vm547_vm3, %v533_v5  ;;  %v691_v12 = vmax.f32 %v621_v7, 0.0 }
 0x16f   : > { %v622_v8 = vpop.f32.mrf.mxu1 }
 0x170   : > { %v623_v11 = vadd.f32 %v3241_v20, %v622_v8 }
 0x172   : > { %v692_v13 = vmax.f32 %v623_v11, 0.0 }
 0x174   : > { %v727_v16 = vpack.c.bf16 %v692_v13, %v691_v12 }
 0x176   : > { %2611 = vmatmul.msk.bf16.gmra.mxu2 %vm755_vm4, %v727_v16 }
 0x177   : > { %v625_v18 = vpop.f32.mrf.mxu1 }
 0x178   : > { %v626_v22 = vadd.f32 %v3241_v20, %v625_v18 }
 0x17a   : > { %2591 = vmatmul.msk.bf16.gmra.mxu1 %vm547_vm3, %v534_v19  ;;  %v693_v28 = vmax.f32 %v626_v22, 0.0 }
 0x17f   : > { %v627_v23 = vpop.f32.mrf.mxu1 }
 0x180   : > { %v628_v27 = vadd.f32 %v3241_v20, %v627_v23 }
 0x182   : > { %v694_v29 = vmax.f32 %v628_v27, 0.0 }
 0x184   : > { %v728_v32 = vpack.c.bf16 %v694_v29, %v693_v28  ;;  %v2857_v28 = vld [vmem:[%s3931_s1 + $0xb8] sm:$0xff] }
 0x185   : > { %1462 = vmatpush.bf16.msra.mxu1 %v2857_v28 }
 0x186   : > { %2612 = vmatmul.msk.bf16.gmra.mxu2 %vm755_vm4, %v728_v32 }
 0x187   : > { %v630_v33 = vpop.f32.mrf.mxu1 }
 0x188   : > { %v631_v36 = vadd.f32 %v3241_v20, %v630_v33 }
 0x18a   : > { %2592 = vmatmul.msk.bf16.gmra.mxu1 %vm547_vm3, %v535_v34  ;;  %v695_v41 = vmax.f32 %v631_v36, 0.0 }
 0x18f   : > { %v632_v37 = vpop.f32.mrf.mxu1 }
 0x190   : > { %v633_v40 = vadd.f32 %v3241_v20, %v632_v37 }
 0x192   : > { %v696_v42 = vmax.f32 %v633_v40, 0.0 }
 0x194   : > { %v729_v46 = vpack.c.bf16 %v696_v42, %v695_v41 }
 0x196   : > { %2613 = vmatmul.msk.bf16.gmra.mxu2 %vm755_vm4, %v729_v46 }
 0x197   : > { %v635_v47 = vpop.f32.mrf.mxu1 }
 0x198   : > { %v636_v51 = vadd.f32 %v3241_v20, %v635_v47 }
 0x19a   : > { %2593 = vmatmul.msk.bf16.gmra.mxu1 %vm547_vm3, %v536_v48  ;;  %v697_v56 = vmax.f32 %v636_v51, 0.0 }
 0x19f   : > { %v637_v52 = vpop.f32.mrf.mxu1 }
 0x1a0   : > { %v638_v55 = vadd.f32 %v3241_v20, %v637_v52 }
 0x1a2   : > { %v698_v57 = vmax.f32 %v638_v55, 0.0 }
 0x1a4   : > { %v730_v61 = vpack.c.bf16 %v698_v57, %v697_v56 }
 0x1a6   : > { %2614 = vmatmul.msk.bf16.gmra.mxu2 %vm755_vm4, %v730_v61 }
 0x1a7   : > { %v640_v62 = vpop.f32.mrf.mxu1 }
 0x1a8   : > { %v641_v0 = vadd.f32 %v3241_v20, %v640_v62 }
 0x1aa   : > { %2594 = vmatmul.msk.bf16.gmra.mxu1 %vm547_vm3, %v537_v63  ;;  %v699_v3 = vmax.f32 %v641_v0, 0.0 }
 0x1af   : > { %v642_v1 = vpop.f32.mrf.mxu1 }
 0x1b0   : > { %v643_v2 = vadd.f32 %v3241_v20, %v642_v1 }
 0x1b2   : > { %v700_v60 = vmax.f32 %v643_v2, 0.0 }
 0x1b4   : > { %v731_v4 = vpack.c.bf16 %v700_v60, %v699_v3 }
 0x1b6   : > { %2615 = vmatmul.msk.bf16.gmra.mxu2 %vm755_vm4, %v731_v4 }
 0x1b7   : > { %v645_v5 = vpop.f32.mrf.mxu1 }
 0x1b8   : > { %v646_v6 = vadd.f32 %v3241_v20, %v645_v5 }
 0x1ba   : > { %v701_v11 = vmax.f32 %v646_v6, 0.0 }
 0x1be   : > { %v813_v7 = vpop.f32.mrf.mxu2 }
 0x1bf   : > { %v647_v8 = vpop.f32.mrf.mxu1  ;;  %v814_v14 = vadd.f32 %v3302_v10, %v813_v7 }
 0x1c0   : > { %v648_v9 = vadd.f32 %v3241_v20, %v647_v8 }
 0x1c1   : > { %v893_v18 = vmax.f32 %v814_v14, 0.0 }
 0x1c2   : > { %v702_v12 = vmax.f32 %v648_v9, 0.0  ;;  %v2853_v9 = vld [vmem:[%s3931_s1 + $0x98] sm:$0xff] }
 0x1c3   : > { %1239 = vmatpush.bf16.msrb.mxu0 %v2853_v9 }
 0x1c4   : > { %v732_v13 = vpack.c.bf16 %v702_v12, %v701_v11 }
 0x1c6   : > { %2616 = vmatmul.msk.bf16.gmra.mxu2 %vm755_vm4, %v732_v13  ;;  %v815_v15 = vpop.f32.mrf.mxu2 }
 0x1c7   : > { %v650_v16 = vpop.f32.mrf.mxu1  ;;  %v816_v17 = vadd.f32 %v3302_v10, %v815_v15 }
 0x1c8   : > { %v651_v22 = vadd.f32 %v3241_v20, %v650_v16 }
 0x1c9   : > { %v894_v19 = vmax.f32 %v816_v17, 0.0 }
 0x1ca   : > { %v703_v25 = vmax.f32 %v651_v22, 0.0 }
 0x1cb   : > { %v932_v21 = vpack.c.bf16 %v894_v19, %v893_v18 }
 0x1cd   : > { %2637 = vmatmul.msk.bf16.vlgmr.msrb.gmra.mxu3 %vm755_vm4, %v932_v21 }
 0x1cf   : > { %v652_v23 = vpop.f32.mrf.mxu1 }
 0x1d0   : > { %v653_v24 = vadd.f32 %v3241_v20, %v652_v23 }
 0x1d2   : > { %v704_v26 = vmax.f32 %v653_v24, 0.0  ;;  %v2856_v24 = vld [vmem:[%s3931_s1 + $0xb0] sm:$0xff] }
 0x1d3   : > { %1463 = vmatpush.bf16.msra.mxu1 %v2856_v24 }
 0x1d4   : > { %v733_v27 = vpack.c.bf16 %v704_v26, %v703_v25 }
 0x1d6   : > { %2617 = vmatmul.msk.bf16.gmra.mxu2 %vm755_vm4, %v733_v27  ;;  %v2852_v27 = vld [vmem:[%s3931_s1 + $0x90] sm:$0xff] }
 0x1d7   : > { %v655_v29 = vpop.f32.mrf.mxu1  ;;  %1240 = vmatpush.bf16.msrb.mxu0 %v2852_v27 }
 0x1d8   : > { %v656_v31 = vadd.f32 %v3241_v20, %v655_v29 }
 0x1d9   : > { %v818_v30 = vpop.f32.mrf.mxu2 }
 0x1da   : > { %v819_v33 = vadd.f32 %v3302_v10, %v818_v30  ;;  %v705_v36 = vmax.f32 %v656_v31, 0.0 }
 0x1dc   : > { %v895_v39 = vmax.f32 %v819_v33, 0.0 }
 0x1df   : > { %v657_v32 = vpop.f32.mrf.mxu1 }
 0x1e0   : > { %v658_v34 = vadd.f32 %v3241_v20, %v657_v32 }
 0x1e1   : > { %v820_v35 = vpop.f32.mrf.mxu2 }
 0x1e2   : > { %v706_v37 = vmax.f32 %v658_v34, 0.0  ;;  %v821_v38 = vadd.f32 %v3302_v10, %v820_v35 }
 0x1e4   : > { %v734_v40 = vpack.c.bf16 %v706_v37, %v705_v36  ;;  %v896_v41 = vmax.f32 %v821_v38, 0.0 }
 0x1e6   : > { %2618 = vmatmul.msk.bf16.gmra.mxu2 %vm755_vm4, %v734_v40  ;;  %v933_v42 = vpack.c.bf16 %v896_v41, %v895_v39 }
 0x1e7   : > { %v660_v43 = vpop.f32.mrf.mxu1 }
 0x1e8   : > { %2638 = vmatmul.msk.bf16.gmra.mxu3 %vm755_vm4, %v933_v42  ;;  %v661_v45 = vadd.f32 %v3241_v20, %v660_v43  ;;  %v2851_v42 = vld [vmem:[%s3931_s1 + $0x88] sm:$0xff] }
 0x1e9   : > { %v823_v44 = vpop.f32.mrf.mxu2  ;;  %1241 = vmatpush.bf16.msrb.mxu0 %v2851_v42 }
 0x1ea   : > { %v824_v47 = vadd.f32 %v3302_v10, %v823_v44  ;;  %v707_v50 = vmax.f32 %v661_v45, 0.0 }
 0x1ec   : > { %v897_v53 = vmax.f32 %v824_v47, 0.0 }
 0x1ef   : > { %v662_v46 = vpop.f32.mrf.mxu1 }
 0x1f0   : > { %v663_v48 = vadd.f32 %v3241_v20, %v662_v46 }
 0x1f1   : > { %v825_v49 = vpop.f32.mrf.mxu2 }
 0x1f2   : > { %v708_v51 = vmax.f32 %v663_v48, 0.0  ;;  %v826_v52 = vadd.f32 %v3302_v10, %v825_v49 }
 0x1f4   : > { %v735_v54 = vpack.c.bf16 %v708_v51, %v707_v50  ;;  %v898_v55 = vmax.f32 %v826_v52, 0.0 }
 0x1f6   : > { %2619 = vmatmul.msk.bf16.gmra.mxu2 %vm755_vm4, %v735_v54  ;;  %v934_v56 = vpack.c.bf16 %v898_v55, %v897_v53 }
 0x1f7   : > { %v665_v57 = vpop.f32.mrf.mxu1 }
 0x1f8   : > { %2639 = vmatmul.msk.bf16.gmra.mxu3 %vm755_vm4, %v934_v56  ;;  %v666_v59 = vadd.f32 %v3241_v20, %v665_v57  ;;  %v2850_v56 = vld [vmem:[%s3931_s1 + $0x80] sm:$0xff] }
 0x1f9   : > { %v828_v58 = vpop.f32.mrf.mxu2  ;;  %1242 = vmatpush.bf16.msrb.mxu0 %v2850_v56 }
 0x1fa   : > { %v829_v62 = vadd.f32 %v3302_v10, %v828_v58  ;;  %v709_v1 = vmax.f32 %v666_v59, 0.0 }
 0x1fc   : > { %v899_v60 = vmax.f32 %v829_v62, 0.0 }
 0x1ff   : > { %v667_v61 = vpop.f32.mrf.mxu1 }
 0x200   : > { %v668_v63 = vadd.f32 %v3241_v20, %v667_v61 }
 0x201   : > { %v830_v0 = vpop.f32.mrf.mxu2 }
 0x202   : > { %v710_v2 = vmax.f32 %v668_v63, 0.0  ;;  %v831_v3 = vadd.f32 %v3302_v10, %v830_v0 }
 0x204   : > { %v736_v4 = vpack.c.bf16 %v710_v2, %v709_v1  ;;  %v900_v5 = vmax.f32 %v831_v3, 0.0 }
 0x206   : > { %2620 = vmatmul.msk.bf16.gmra.mxu2 %vm755_vm4, %v736_v4  ;;  %v935_v6 = vpack.c.bf16 %v900_v5, %v899_v60  ;;  %v3373_v60 = vld [vmem:[%s3932_s2 + $0x3] ss:$0 sm:$0xff] }
 0x207   : > { %v670_v7 = vpop.f32.mrf.mxu1 }
 0x208   : > { %2640 = vmatmul.msk.bf16.gmra.mxu3 %vm755_vm4, %v935_v6  ;;  %v671_v11 = vadd.f32 %v3241_v20, %v670_v7  ;;  %v2855_v7 = vld [vmem:[%s3931_s1 + $0xa8] sm:$0xff] }
 0x209   : > { %v833_v8 = vpop.f32.mrf.mxu2  ;;  %1464 = vmatpush.bf16.msra.mxu1 %v2855_v7 }
 0x20a   : > { %v834_v13 = vadd.f32 %v3302_v10, %v833_v8  ;;  %v711_v16 = vmax.f32 %v671_v11, 0.0 }
 0x20c   : > { %v901_v19 = vmax.f32 %v834_v13, 0.0 }
 0x20f   : > { %v672_v12 = vpop.f32.mrf.mxu1 }
 0x210   : > { %v673_v14 = vadd.f32 %v3241_v20, %v672_v12 }
 0x211   : > { %v835_v15 = vpop.f32.mrf.mxu2 }
 0x212   : > { %v712_v17 = vmax.f32 %v673_v14, 0.0  ;;  %v836_v18 = vadd.f32 %v3302_v10, %v835_v15 }
 0x214   : > { %v737_v21 = vpack.c.bf16 %v712_v17, %v711_v16  ;;  %v902_v22 = vmax.f32 %v836_v18, 0.0 }
 0x216   : > { %2621 = vmatmul.msk.bf16.gmra.mxu2 %vm755_vm4, %v737_v21  ;;  %v936_v23 = vpack.c.bf16 %v902_v22, %v901_v19 }
 0x217   : > { %v675_v25 = vpop.f32.mrf.mxu1 }
 0x218   : > { %2641 = vmatmul.msk.bf16.gmra.mxu3 %vm755_vm4, %v936_v23  ;;  %v676_v28 = vadd.f32 %v3241_v20, %v675_v25  ;;  %v2861_v23 = vld [vmem:[%s3931_s1 + $0xd8] sm:$0xff] }
 0x219   : > { %v838_v26 = vpop.f32.mrf.mxu2  ;;  %1685 = vmatpush.bf16.msra.mxu2 %v2861_v23 }
 0x21a   : > { %v839_v30 = vadd.f32 %v3302_v10, %v838_v26  ;;  %v713_v33 = vmax.f32 %v676_v28, 0.0 }
 0x21c   : > { %v903_v36 = vmax.f32 %v839_v30, 0.0 }
 0x21f   : > { %v677_v29 = vpop.f32.mrf.mxu1 }
 0x220   : > { %v678_v31 = vadd.f32 %v3241_v20, %v677_v29 }
 0x221   : > { %v840_v32 = vpop.f32.mrf.mxu2 }
 0x222   : > { %v714_v34 = vmax.f32 %v678_v31, 0.0  ;;  %v841_v35 = vadd.f32 %v3302_v10, %v840_v32 }
 0x224   : > { %v738_v37 = vpack.c.bf16 %v714_v34, %v713_v33  ;;  %v904_v38 = vmax.f32 %v841_v35, 0.0 }
 0x226   : > { %2622 = vmatmul.msk.bf16.gmra.mxu2 %vm755_vm4, %v738_v37  ;;  %v937_v39 = vpack.c.bf16 %v904_v38, %v903_v36 }
 0x227   : > { %v680_v40 = vpop.f32.mrf.mxu1 }
 0x228   : > { %2642 = vmatmul.msk.bf16.gmra.mxu3 %vm755_vm4, %v937_v39  ;;  %v681_v43 = vadd.f32 %v3241_v20, %v680_v40 }
 0x229   : > { %v843_v41 = vpop.f32.mrf.mxu2 }
 0x22a   : > { %v844_v45 = vadd.f32 %v3302_v10, %v843_v41  ;;  %v715_v48 = vmax.f32 %v681_v43, 0.0 }
 0x22c   : > { %v905_v51 = vmax.f32 %v844_v45, 0.0 }
 0x22f   : > { %v682_v44 = vpop.f32.mrf.mxu1 }
 0x230   : > { %v683_v46 = vadd.f32 %v3241_v20, %v682_v44 }
 0x231   : > { %v845_v47 = vpop.f32.mrf.mxu2 }
 0x232   : > { %v716_v49 = vmax.f32 %v683_v46, 0.0  ;;  %v846_v50 = vadd.f32 %v3302_v10, %v845_v47 }
 0x234   : > { %v739_v52 = vpack.c.bf16 %v716_v49, %v715_v48  ;;  %v906_v53 = vmax.f32 %v846_v50, 0.0 }
 0x236   : > { %2623 = vmatmul.msk.bf16.gmra.mxu2 %vm755_vm4, %v739_v52  ;;  %v938_v54 = vpack.c.bf16 %v906_v53, %v905_v51 }
 0x238   : > { %2643 = vmatmul.msk.bf16.gmra.mxu3 %vm755_vm4, %v938_v54 }
 0x239   : > { %v848_v55 = vpop.f32.mrf.mxu2 }
 0x23a   : > { %v849_v20 = vadd.f32 %v3302_v10, %v848_v55 }
 0x23c   : > { %v907_v59 = vmax.f32 %v849_v20, 0.0 }
 0x241   : > { %v850_v57 = vpop.f32.mrf.mxu2 }
 0x242   : > { %v851_v58 = vadd.f32 %v3302_v10, %v850_v57 }
 0x244   : > { %v908_v61 = vmax.f32 %v851_v58, 0.0 }
 0x246   : > { %v939_v62 = vpack.c.bf16 %v908_v61, %v907_v59 }
 0x248   : > { %2644 = vmatmul.msk.bf16.gmra.mxu3 %vm755_vm4, %v939_v62 }
 0x249   : > { %v853_v63 = vpop.f32.mrf.mxu2 }
 0x24a   : > { %v854_v0 = vadd.f32 %v3302_v10, %v853_v63 }
 0x24c   : > { %v909_v4 = vmax.f32 %v854_v0, 0.0 }
 0x250   : > { %v1020_v1 = vpop.f32.mrf.mxu3 }
 0x251   : > { %v855_v2 = vpop.f32.mrf.mxu2  ;;  %v1021_v8 = vadd.f32 %v3373_v60, %v1020_v1  ;;  %v2854_v1 = vld [vmem:[%s3931_s1 + $0xa0] sm:$0xff] }
 0x252   : > { %v856_v3 = vadd.f32 %v3302_v10, %v855_v2  ;;  %1465 = vmatpush.bf16.msra.mxu1 %v2854_v1 }
 0x253   : > { %v1100_v13 = vmax.f32 %v1021_v8, 0.0 }
 0x254   : > { %v910_v5 = vmax.f32 %v856_v3, 0.0 }
 0x256   : > { %v940_v6 = vpack.c.bf16 %v910_v5, %v909_v4 }
 0x258   : > { %2645 = vmatmul.msk.bf16.gmra.mxu3 %vm755_vm4, %v940_v6  ;;  %v1022_v9 = vpop.f32.mrf.mxu3 }
 0x259   : > { %v858_v11 = vpop.f32.mrf.mxu2  ;;  %v1023_v12 = vadd.f32 %v3373_v60, %v1022_v9 }
 0x25a   : > { %v859_v16 = vadd.f32 %v3302_v10, %v858_v11 }
 0x25b   : > { %v1101_v14 = vmax.f32 %v1023_v12, 0.0 }
 0x25c   : > { %v911_v19 = vmax.f32 %v859_v16, 0.0 }
 0x25d   : > { %v1143_v15 = vpack.c.bf16 %v1101_v14, %v1100_v13 }
 0x25f   : > { %2678 = vmatmul.msk.bf16.vlgmr.msrb.gmra.mxu0 %vm1186_vm5, %v1143_v15 }
 0x261   : > { %v860_v17 = vpop.f32.mrf.mxu2 }
 0x262   : > { %v861_v18 = vadd.f32 %v3302_v10, %v860_v17  ;;  %v2860_v17 = vld [vmem:[%s3931_s1 + $0xd0] sm:$0xff] }
 0x263   : > { %1686 = vmatpush.bf16.msra.mxu2 %v2860_v17 }
 0x264   : > { %v912_v21 = vmax.f32 %v861_v18, 0.0 }
 0x266   : > { %v941_v22 = vpack.c.bf16 %v912_v21, %v911_v19 }
 0x268   : > { %2646 = vmatmul.msk.bf16.gmra.mxu3 %vm755_vm4, %v941_v22 }
 0x269   : > { %v863_v24 = vpop.f32.mrf.mxu2 }
 0x26a   : > { %v864_v26 = vadd.f32 %v3302_v10, %v863_v24 }
 0x26b   : > { %v1025_v25 = vpop.f32.mrf.mxu3 }
 0x26c   : > { %v1026_v28 = vadd.f32 %v3373_v60, %v1025_v25  ;;  %v913_v31 = vmax.f32 %v864_v26, 0.0 }
 0x26e   : > { %v1102_v34 = vmax.f32 %v1026_v28, 0.0 }
 0x271   : > { %v865_v27 = vpop.f32.mrf.mxu2 }
 0x272   : > { %v866_v29 = vadd.f32 %v3302_v10, %v865_v27 }
 0x273   : > { %v1027_v30 = vpop.f32.mrf.mxu3 }
 0x274   : > { %v914_v32 = vmax.f32 %v866_v29, 0.0  ;;  %v1028_v33 = vadd.f32 %v3373_v60, %v1027_v30 }
 0x276   : > { %v942_v35 = vpack.c.bf16 %v914_v32, %v913_v31  ;;  %v1103_v36 = vmax.f32 %v1028_v33, 0.0 }
 0x278   : > { %2647 = vmatmul.msk.bf16.gmra.mxu3 %vm755_vm4, %v942_v35  ;;  %v1144_v37 = vpack.c.bf16 %v1103_v36, %v1102_v34 }
 0x279   : > { %v868_v38 = vpop.f32.mrf.mxu2 }
 0x27a   : > { %2679 = vmatmul.msk.bf16.gmra.mxu0 %vm1186_vm5, %v1144_v37  ;;  %v869_v40 = vadd.f32 %v3302_v10, %v868_v38 }
 0x27b   : > { %v1030_v39 = vpop.f32.mrf.mxu3 }
 0x27c   : > { %v1031_v42 = vadd.f32 %v3373_v60, %v1030_v39  ;;  %v915_v45 = vmax.f32 %v869_v40, 0.0 }
 0x27e   : > { %v1104_v48 = vmax.f32 %v1031_v42, 0.0 }
 0x281   : > { %v870_v41 = vpop.f32.mrf.mxu2 }
 0x282   : > { %v871_v43 = vadd.f32 %v3302_v10, %v870_v41 }
 0x283   : > { %v1032_v44 = vpop.f32.mrf.mxu3 }
 0x284   : > { %v916_v46 = vmax.f32 %v871_v43, 0.0  ;;  %v1033_v47 = vadd.f32 %v3373_v60, %v1032_v44 }
 0x286   : > { %v943_v49 = vpack.c.bf16 %v916_v46, %v915_v45  ;;  %v1105_v50 = vmax.f32 %v1033_v47, 0.0 }
 0x288   : > { %2648 = vmatmul.msk.bf16.gmra.mxu3 %vm755_vm4, %v943_v49  ;;  %v1145_v51 = vpack.c.bf16 %v1105_v50, %v1104_v48 }
 0x289   : > { %v873_v52 = vpop.f32.mrf.mxu2 }
 0x28a   : > { %2680 = vmatmul.msk.bf16.gmra.mxu0 %vm1186_vm5, %v1145_v51  ;;  %v874_v54 = vadd.f32 %v3302_v10, %v873_v52 }
 0x28b   : > { %v1035_v53 = vpop.f32.mrf.mxu3 }
 0x28c   : > { %v1036_v56 = vadd.f32 %v3373_v60, %v1035_v53  ;;  %v917_v58 = vmax.f32 %v874_v54, 0.0 }
 0x28e   : > { %v1106_v62 = vmax.f32 %v1036_v56, 0.0  ;;  %v3436_v56 = vld [vmem:[%s3932_s2 + $0x4] ss:$0 sm:$0xff] }
 0x291   : > { %v875_v55 = vpop.f32.mrf.mxu2 }
 0x292   : > { %v876_v20 = vadd.f32 %v3302_v10, %v875_v55 }
 0x293   : > { %v1037_v57 = vpop.f32.mrf.mxu3 }
 0x294   : > { %v918_v59 = vmax.f32 %v876_v20, 0.0  ;;  %v1038_v61 = vadd.f32 %v3373_v60, %v1037_v57 }
 0x296   : > { %v944_v63 = vpack.c.bf16 %v918_v59, %v917_v58  ;;  %v1107_v0 = vmax.f32 %v1038_v61, 0.0 }
 0x298   : > { %2649 = vmatmul.msk.bf16.gmra.mxu3 %vm755_vm4, %v944_v63  ;;  %v1146_v2 = vpack.c.bf16 %v1107_v0, %v1106_v62  ;;  %v2859_v62 = vld [vmem:[%s3931_s1 + $0xc8] sm:$0xff] }
 0x299   : > { %v878_v3 = vpop.f32.mrf.mxu2  ;;  %1687 = vmatpush.bf16.msra.mxu2 %v2859_v62 }
 0x29a   : > { %2681 = vmatmul.msk.bf16.gmra.mxu0 %vm1186_vm5, %v1146_v2  ;;  %v879_v5 = vadd.f32 %v3302_v10, %v878_v3 }
 0x29b   : > { %v1040_v4 = vpop.f32.mrf.mxu3 }
 0x29c   : > { %v1041_v7 = vadd.f32 %v3373_v60, %v1040_v4  ;;  %v919_v11 = vmax.f32 %v879_v5, 0.0 }
 0x29e   : > { %v1108_v14 = vmax.f32 %v1041_v7, 0.0 }
 0x2a1   : > { %v880_v6 = vpop.f32.mrf.mxu2 }
 0x2a2   : > { %v881_v8 = vadd.f32 %v3302_v10, %v880_v6 }
 0x2a3   : > { %v1042_v9 = vpop.f32.mrf.mxu3 }
 0x2a4   : > { %v920_v12 = vmax.f32 %v881_v8, 0.0  ;;  %v1043_v13 = vadd.f32 %v3373_v60, %v1042_v9 }
 0x2a6   : > { %v945_v15 = vpack.c.bf16 %v920_v12, %v919_v11  ;;  %v1109_v16 = vmax.f32 %v1043_v13, 0.0 }
 0x2a8   : > { %2650 = vmatmul.msk.bf16.gmra.mxu3 %vm755_vm4, %v945_v15  ;;  %v1147_v18 = vpack.c.bf16 %v1109_v16, %v1108_v14  ;;  %v2863_v15 = vld [vmem:[%s3931_s1 + $0xe8] sm:$0xff] }
 0x2a9   : > { %v883_v19 = vpop.f32.mrf.mxu2  ;;  %1894 = vmatpush.bf16.msra.mxu3 %v2863_v15 }
 0x2aa   : > { %2682 = vmatmul.msk.bf16.gmra.mxu0 %vm1186_vm5, %v1147_v18  ;;  %v884_v22 = vadd.f32 %v3302_v10, %v883_v19 }
 0x2ab   : > { %v1045_v21 = vpop.f32.mrf.mxu3 }
 0x2ac   : > { %v1046_v24 = vadd.f32 %v3373_v60, %v1045_v21  ;;  %v921_v27 = vmax.f32 %v884_v22, 0.0 }
 0x2ae   : > { %v1110_v30 = vmax.f32 %v1046_v24, 0.0 }
 0x2b1   : > { %v885_v23 = vpop.f32.mrf.mxu2 }
 0x2b2   : > { %v886_v25 = vadd.f32 %v3302_v10, %v885_v23 }
 0x2b3   : > { %v1047_v26 = vpop.f32.mrf.mxu3 }
 0x2b4   : > { %v922_v28 = vmax.f32 %v886_v25, 0.0  ;;  %v1048_v29 = vadd.f32 %v3373_v60, %v1047_v26 }
 0x2b6   : > { %v946_v31 = vpack.c.bf16 %v922_v28, %v921_v27  ;;  %v1111_v32 = vmax.f32 %v1048_v29, 0.0 }
 0x2b8   : > { %2651 = vmatmul.msk.bf16.gmra.mxu3 %vm755_vm4, %v946_v31  ;;  %v1148_v33 = vpack.c.bf16 %v1111_v32, %v1110_v30 }
 0x2b9   : > { %v888_v34 = vpop.f32.mrf.mxu2 }
 0x2ba   : > { %2683 = vmatmul.msk.bf16.gmra.mxu0 %vm1186_vm5, %v1148_v33  ;;  %v889_v36 = vadd.f32 %v3302_v10, %v888_v34 }
 0x2bb   : > { %v1050_v35 = vpop.f32.mrf.mxu3 }
 0x2bc   : > { %v1051_v38 = vadd.f32 %v3373_v60, %v1050_v35  ;;  %v923_v41 = vmax.f32 %v889_v36, 0.0 }
 0x2be   : > { %v1112_v44 = vmax.f32 %v1051_v38, 0.0 }
 0x2c1   : > { %v890_v37 = vpop.f32.mrf.mxu2 }
 0x2c2   : > { %v891_v39 = vadd.f32 %v3302_v10, %v890_v37 }
 0x2c3   : > { %v1052_v40 = vpop.f32.mrf.mxu3 }
 0x2c4   : > { %v924_v42 = vmax.f32 %v891_v39, 0.0  ;;  %v1053_v43 = vadd.f32 %v3373_v60, %v1052_v40 }
 0x2c6   : > { %v947_v45 = vpack.c.bf16 %v924_v42, %v923_v41  ;;  %v1113_v46 = vmax.f32 %v1053_v43, 0.0 }
 0x2c8   : > { %2652 = vmatmul.msk.bf16.gmra.mxu3 %vm755_vm4, %v947_v45  ;;  %v1149_v47 = vpack.c.bf16 %v1113_v46, %v1112_v44 }
 0x2ca   : > { %2684 = vmatmul.msk.bf16.gmra.mxu0 %vm1186_vm5, %v1149_v47 }
 0x2cb   : > { %v1055_v48 = vpop.f32.mrf.mxu3 }
 0x2cc   : > { %v1056_v49 = vadd.f32 %v3373_v60, %v1055_v48 }
 0x2ce   : > { %v1114_v10 = vmax.f32 %v1056_v49, 0.0 }
 0x2d3   : > { %v1057_v50 = vpop.f32.mrf.mxu3 }
 0x2d4   : > { %v1058_v51 = vadd.f32 %v3373_v60, %v1057_v50 }
 0x2d6   : > { %v1115_v52 = vmax.f32 %v1058_v51, 0.0 }
 0x2d8   : > { %v1150_v53 = vpack.c.bf16 %v1115_v52, %v1114_v10 }
 0x2da   : > { %2685 = vmatmul.msk.bf16.gmra.mxu0 %vm1186_vm5, %v1150_v53 }
 0x2db   : > { %v1060_v54 = vpop.f32.mrf.mxu3 }
 0x2dc   : > { %v1244_v55 = vpop.f32.mrf.mxu0  ;;  %v1061_v20 = vadd.f32 %v3373_v60, %v1060_v54  ;;  %v2858_v54 = vld [vmem:[%s3931_s1 + $0xc0] sm:$0xff] }
 0x2dd   : > { %v1245_v58 = vadd.f32 %v3436_v56, %v1244_v55  ;;  %1688 = vmatpush.bf16.msra.mxu2 %v2858_v54 }
 0x2de   : > { %v1116_v0 = vmax.f32 %v1061_v20, 0.0 }
 0x2df   : > { %v1324_v2 = vmax.f32 %v1245_v58, 0.0 }
 0x2e3   : > { %v1062_v57 = vpop.f32.mrf.mxu3 }
 0x2e4   : > { %v1063_v59 = vadd.f32 %v3373_v60, %v1062_v57  ;;  %v1246_v61 = vpop.f32.mrf.mxu0 }
 0x2e5   : > { %v1247_v63 = vadd.f32 %v3436_v56, %v1246_v61 }
 0x2e6   : > { %v1117_v1 = vmax.f32 %v1063_v59, 0.0 }
 0x2e7   : > { %v1325_v3 = vmax.f32 %v1247_v63, 0.0 }
 0x2e8   : > { %v1151_v4 = vpack.c.bf16 %v1117_v1, %v1116_v0 }
 0x2e9   : > { %v1367_v5 = vpack.c.bf16 %v1325_v3, %v1324_v2 }
 0x2ea   : > { %2686 = vmatmul.msk.bf16.gmra.mxu0 %vm1186_vm5, %v1151_v4 }
 0x2eb   : > { %v1065_v6 = vpop.f32.mrf.mxu3  ;;  %2719 = vmatmul.msk.bf16.vlgmr.msra.gmra.mxu1 %vm1186_vm5, %v1367_v5 }
 0x2ec   : > { %v1066_v7 = vadd.f32 %v3373_v60, %v1065_v6 }
 0x2ee   : > { %v1118_v11 = vmax.f32 %v1066_v7, 0.0 }
 0x2f3   : > { %v1067_v8 = vpop.f32.mrf.mxu3 }
 0x2f4   : > { %v1068_v9 = vadd.f32 %v3373_v60, %v1067_v8 }
 0x2f6   : > { %v1119_v12 = vmax.f32 %v1068_v9, 0.0 }
 0x2f7   : > { %v1249_v13 = vpop.f32.mrf.mxu0 }
 0x2f8   : > { %v1152_v14 = vpack.c.bf16 %v1119_v12, %v1118_v11  ;;  %v1250_v17 = vadd.f32 %v3436_v56, %v1249_v13 }
 0x2fa   : > { %2687 = vmatmul.msk.bf16.gmra.mxu0 %vm1186_vm5, %v1152_v14  ;;  %v1326_v21 = vmax.f32 %v1250_v17, 0.0 }
 0x2fb   : > { %v1070_v16 = vpop.f32.mrf.mxu3 }
 0x2fc   : > { %v1071_v22 = vadd.f32 %v3373_v60, %v1070_v16 }
 0x2fe   : > { %v1120_v27 = vmax.f32 %v1071_v22, 0.0 }
 0x2ff   : > { %v1251_v18 = vpop.f32.mrf.mxu0 }
 0x300   : > { %v1252_v19 = vadd.f32 %v3436_v56, %v1251_v18 }
 0x302   : > { %v1327_v23 = vmax.f32 %v1252_v19, 0.0 }
 0x303   : > { %v1072_v24 = vpop.f32.mrf.mxu3 }
 0x304   : > { %v1368_v25 = vpack.c.bf16 %v1327_v23, %v1326_v21  ;;  %v1073_v26 = vadd.f32 %v3373_v60, %v1072_v24 }
 0x306   : > { %v1121_v28 = vmax.f32 %v1073_v26, 0.0  ;;  %2720 = vmatmul.msk.bf16.gmra.mxu1 %vm1186_vm5, %v1368_v25 }
 0x307   : > { %v1254_v29 = vpop.f32.mrf.mxu0 }
 0x308   : > { %v1153_v30 = vpack.c.bf16 %v1121_v28, %v1120_v27  ;;  %v1255_v32 = vadd.f32 %v3436_v56, %v1254_v29 }
 0x30a   : > { %2688 = vmatmul.msk.bf16.gmra.mxu0 %vm1186_vm5, %v1153_v30  ;;  %v1328_v35 = vmax.f32 %v1255_v32, 0.0 }
 0x30b   : > { %v1075_v31 = vpop.f32.mrf.mxu3 }
 0x30c   : > { %v1076_v36 = vadd.f32 %v3373_v60, %v1075_v31 }
 0x30e   : > { %v1122_v41 = vmax.f32 %v1076_v36, 0.0 }
 0x30f   : > { %v1256_v33 = vpop.f32.mrf.mxu0 }
 0x310   : > { %v1257_v34 = vadd.f32 %v3436_v56, %v1256_v33 }
 0x312   : > { %v1329_v37 = vmax.f32 %v1257_v34, 0.0 }
 0x313   : > { %v1077_v38 = vpop.f32.mrf.mxu3 }
 0x314   : > { %v1369_v39 = vpack.c.bf16 %v1329_v37, %v1328_v35  ;;  %v1078_v40 = vadd.f32 %v3373_v60, %v1077_v38 }
 0x316   : > { %v1123_v42 = vmax.f32 %v1078_v40, 0.0  ;;  %2721 = vmatmul.msk.bf16.gmra.mxu1 %vm1186_vm5, %v1369_v39 }
 0x317   : > { %v1259_v43 = vpop.f32.mrf.mxu0 }
 0x318   : > { %v1154_v44 = vpack.c.bf16 %v1123_v42, %v1122_v41  ;;  %v1260_v46 = vadd.f32 %v3436_v56, %v1259_v43 }
 0x31a   : > { %2689 = vmatmul.msk.bf16.gmra.mxu0 %vm1186_vm5, %v1154_v44  ;;  %v1330_v49 = vmax.f32 %v1260_v46, 0.0 }
 0x31b   : > { %v1080_v45 = vpop.f32.mrf.mxu3 }
 0x31c   : > { %v1081_v50 = vadd.f32 %v3373_v60, %v1080_v45 }
 0x31e   : > { %v1124_v55 = vmax.f32 %v1081_v50, 0.0 }
 0x31f   : > { %v1261_v47 = vpop.f32.mrf.mxu0 }
 0x320   : > { %v1262_v48 = vadd.f32 %v3436_v56, %v1261_v47  ;;  %v3498_v47 = vld [vmem:[%s3932_s2 + $0x5] ss:$0 sm:$0xff] }
 0x322   : > { %v1331_v51 = vmax.f32 %v1262_v48, 0.0 }
 0x323   : > { %v1082_v10 = vpop.f32.mrf.mxu3 }
 0x324   : > { %v1370_v52 = vpack.c.bf16 %v1331_v51, %v1330_v49  ;;  %v1083_v53 = vadd.f32 %v3373_v60, %v1082_v10 }
 0x326   : > { %v1125_v20 = vmax.f32 %v1083_v53, 0.0  ;;  %2722 = vmatmul.msk.bf16.gmra.mxu1 %vm1186_vm5, %v1370_v52 }
 0x327   : > { %v1264_v57 = vpop.f32.mrf.mxu0 }
 0x328   : > { %v1155_v58 = vpack.c.bf16 %v1125_v20, %v1124_v55  ;;  %v1265_v61 = vadd.f32 %v3436_v56, %v1264_v57 }
 0x32a   : > { %2690 = vmatmul.msk.bf16.gmra.mxu0 %vm1186_vm5, %v1155_v58  ;;  %v1332_v0 = vmax.f32 %v1265_v61, 0.0 }
 0x32b   : > { %v1085_v59 = vpop.f32.mrf.mxu3 }
 0x32c   : > { %v1086_v1 = vadd.f32 %v3373_v60, %v1085_v59  ;;  %v2862_v59 = vld [vmem:[%s3931_s1 + $0xe0] sm:$0xff] }
 0x32d   : > { %1895 = vmatpush.bf16.msra.mxu3 %v2862_v59 }
 0x32e   : > { %v1126_v6 = vmax.f32 %v1086_v1, 0.0 }
 0x32f   : > { %v1266_v62 = vpop.f32.mrf.mxu0 }
 0x330   : > { %v1267_v63 = vadd.f32 %v3436_v56, %v1266_v62 }
 0x332   : > { %v1333_v2 = vmax.f32 %v1267_v63, 0.0 }
 0x333   : > { %v1087_v3 = vpop.f32.mrf.mxu3 }
 0x334   : > { %v1371_v4 = vpack.c.bf16 %v1333_v2, %v1332_v0  ;;  %v1088_v5 = vadd.f32 %v3373_v60, %v1087_v3 }
 0x336   : > { %v1127_v7 = vmax.f32 %v1088_v5, 0.0  ;;  %2723 = vmatmul.msk.bf16.gmra.mxu1 %vm1186_vm5, %v1371_v4  ;;  %v2864_v5 = vld [vmem:[%s3931_s1 + $0x100] sm:$0xff] }
 0x337   : > { %v1269_v8 = vpop.f32.mrf.mxu0  ;;  %2094 = vmatpush.bf16.msra.mxu0 %v2864_v5 }
 0x338   : > { %v1156_v9 = vpack.c.bf16 %v1127_v7, %v1126_v6  ;;  %v1270_v12 = vadd.f32 %v3436_v56, %v1269_v8 }
 0x33a   : > { %2691 = vmatmul.msk.bf16.gmra.mxu0 %vm1186_vm5, %v1156_v9  ;;  %v1334_v15 = vmax.f32 %v1270_v12, 0.0 }
 0x33b   : > { %v1090_v11 = vpop.f32.mrf.mxu3 }
 0x33c   : > { %v1091_v16 = vadd.f32 %v3373_v60, %v1090_v11 }
 0x33e   : > { %v1128_v22 = vmax.f32 %v1091_v16, 0.0 }
 0x33f   : > { %v1271_v13 = vpop.f32.mrf.mxu0 }
 0x340   : > { %v1272_v14 = vadd.f32 %v3436_v56, %v1271_v13 }
 0x342   : > { %v1335_v17 = vmax.f32 %v1272_v14, 0.0 }
 0x343   : > { %v1092_v18 = vpop.f32.mrf.mxu3 }
 0x344   : > { %v1372_v19 = vpack.c.bf16 %v1335_v17, %v1334_v15  ;;  %v1093_v21 = vadd.f32 %v3373_v60, %v1092_v18 }
 0x346   : > { %v1129_v23 = vmax.f32 %v1093_v21, 0.0  ;;  %2724 = vmatmul.msk.bf16.gmra.mxu1 %vm1186_vm5, %v1372_v19 }
 0x347   : > { %v1274_v24 = vpop.f32.mrf.mxu0 }
 0x348   : > { %v1157_v25 = vpack.c.bf16 %v1129_v23, %v1128_v22  ;;  %v1275_v27 = vadd.f32 %v3436_v56, %v1274_v24 }
 0x34a   : > { %2692 = vmatmul.msk.bf16.gmra.mxu0 %vm1186_vm5, %v1157_v25  ;;  %v1336_v30 = vmax.f32 %v1275_v27, 0.0 }
 0x34b   : > { %v1095_v26 = vpop.f32.mrf.mxu3 }
 0x34c   : > { %v1096_v31 = vadd.f32 %v3373_v60, %v1095_v26 }
 0x34e   : > { %v1130_v36 = vmax.f32 %v1096_v31, 0.0 }
 0x34f   : > { %v1276_v28 = vpop.f32.mrf.mxu0 }
 0x350   : > { %v1277_v29 = vadd.f32 %v3436_v56, %v1276_v28 }
 0x352   : > { %v1337_v32 = vmax.f32 %v1277_v29, 0.0 }
 0x353   : > { %v1097_v33 = vpop.f32.mrf.mxu3 }
 0x354   : > { %v1373_v34 = vpack.c.bf16 %v1337_v32, %v1336_v30  ;;  %v1098_v35 = vadd.f32 %v3373_v60, %v1097_v33 }
 0x356   : > { %v1131_v37 = vmax.f32 %v1098_v35, 0.0  ;;  %2725 = vmatmul.msk.bf16.gmra.mxu1 %vm1186_vm5, %v1373_v34 }
 0x357   : > { %v1279_v38 = vpop.f32.mrf.mxu0 }
 0x358   : > { %v1158_v39 = vpack.c.bf16 %v1131_v37, %v1130_v36  ;;  %v1280_v40 = vadd.f32 %v3436_v56, %v1279_v38 }
 0x35a   : > { %2693 = vmatmul.msk.bf16.gmra.mxu0 %vm1186_vm5, %v1158_v39  ;;  %v1338_v43 = vmax.f32 %v1280_v40, 0.0 }
 0x35f   : > { %v1281_v41 = vpop.f32.mrf.mxu0 }
 0x360   : > { %v1282_v42 = vadd.f32 %v3436_v56, %v1281_v41 }
 0x362   : > { %v1339_v44 = vmax.f32 %v1282_v42, 0.0 }
 0x364   : > { %v1374_v45 = vpack.c.bf16 %v1339_v44, %v1338_v43 }
 0x366   : > { %2726 = vmatmul.msk.bf16.gmra.mxu1 %vm1186_vm5, %v1374_v45 }
 0x367   : > { %v1284_v46 = vpop.f32.mrf.mxu0 }
 0x368   : > { %v1467_v60 = vpop.f32.mrf.mxu1  ;;  %v1285_v48 = vadd.f32 %v3436_v56, %v1284_v46 }
 0x369   : > { %v1468_v50 = vadd.f32 %v3498_v47, %v1467_v60 }
 0x36a   : > { %v1340_v53 = vmax.f32 %v1285_v48, 0.0 }
 0x36b   : > { %v1547_v55 = vmax.f32 %v1468_v50, 0.0 }
 0x36f   : > { %v1286_v49 = vpop.f32.mrf.mxu0 }
 0x370   : > { %v1287_v51 = vadd.f32 %v3436_v56, %v1286_v49  ;;  %v1469_v10 = vpop.f32.mrf.mxu1 }
 0x371   : > { %v1470_v52 = vadd.f32 %v3498_v47, %v1469_v10 }
 0x372   : > { %v1341_v54 = vmax.f32 %v1287_v51, 0.0 }
 0x373   : > { %v1548_v20 = vmax.f32 %v1470_v52, 0.0 }
 0x374   : > { %v1375_v57 = vpack.c.bf16 %v1341_v54, %v1340_v53 }
 0x375   : > { %v1590_v58 = vpack.c.bf16 %v1548_v20, %v1547_v55 }
 0x376   : > { %2727 = vmatmul.msk.bf16.gmra.mxu1 %vm1186_vm5, %v1375_v57 }
 0x377   : > { %v1289_v61 = vpop.f32.mrf.mxu0  ;;  %2760 = vmatmul.msk.bf16.vlgmr.msra.gmra.mxu2 %vm1186_vm5, %v1590_v58 }
 0x378   : > { %v1290_v62 = vadd.f32 %v3436_v56, %v1289_v61 }
 0x37a   : > { %v1342_v1 = vmax.f32 %v1290_v62, 0.0 }
 0x37f   : > { %v1291_v63 = vpop.f32.mrf.mxu0 }
 0x380   : > { %v1292_v0 = vadd.f32 %v3436_v56, %v1291_v63 }
 0x382   : > { %v1343_v2 = vmax.f32 %v1292_v0, 0.0 }
 0x383   : > { %v1472_v3 = vpop.f32.mrf.mxu1 }
 0x384   : > { %v1376_v4 = vpack.c.bf16 %v1343_v2, %v1342_v1  ;;  %v1473_v7 = vadd.f32 %v3498_v47, %v1472_v3 }
 0x386   : > { %2728 = vmatmul.msk.bf16.gmra.mxu1 %vm1186_vm5, %v1376_v4  ;;  %v1549_v11 = vmax.f32 %v1473_v7, 0.0 }
 0x387   : > { %v1294_v6 = vpop.f32.mrf.mxu0 }
 0x388   : > { %v1295_v12 = vadd.f32 %v3436_v56, %v1294_v6 }
 0x38a   : > { %v1344_v17 = vmax.f32 %v1295_v12, 0.0 }
 0x38b   : > { %v1474_v8 = vpop.f32.mrf.mxu1 }
 0x38c   : > { %v1475_v9 = vadd.f32 %v3498_v47, %v1474_v8 }
 0x38e   : > { %v1550_v13 = vmax.f32 %v1475_v9, 0.0 }
 0x38f   : > { %v1296_v14 = vpop.f32.mrf.mxu0 }
 0x390   : > { %v1591_v15 = vpack.c.bf16 %v1550_v13, %v1549_v11  ;;  %v1297_v16 = vadd.f32 %v3436_v56, %v1296_v14 }
 0x392   : > { %v1345_v18 = vmax.f32 %v1297_v16, 0.0  ;;  %2761 = vmatmul.msk.bf16.gmra.mxu2 %vm1186_vm5, %v1591_v15 }
 0x393   : > { %v1477_v19 = vpop.f32.mrf.mxu1 }
 0x394   : > { %v1377_v21 = vpack.c.bf16 %v1345_v18, %v1344_v17  ;;  %v1478_v23 = vadd.f32 %v3498_v47, %v1477_v19 }
 0x396   : > { %2729 = vmatmul.msk.bf16.gmra.mxu1 %vm1186_vm5, %v1377_v21  ;;  %v1551_v26 = vmax.f32 %v1478_v23, 0.0 }
 0x397   : > { %v1299_v22 = vpop.f32.mrf.mxu0 }
 0x398   : > { %v1300_v27 = vadd.f32 %v3436_v56, %v1299_v22 }
 0x39a   : > { %v1346_v32 = vmax.f32 %v1300_v27, 0.0 }
 0x39b   : > { %v1479_v24 = vpop.f32.mrf.mxu1 }
 0x39c   : > { %v1480_v25 = vadd.f32 %v3498_v47, %v1479_v24 }
 0x39e   : > { %v1552_v28 = vmax.f32 %v1480_v25, 0.0 }
 0x39f   : > { %v1301_v29 = vpop.f32.mrf.mxu0 }
 0x3a0   : > { %v1592_v30 = vpack.c.bf16 %v1552_v28, %v1551_v26  ;;  %v1302_v31 = vadd.f32 %v3436_v56, %v1301_v29 }
 0x3a2   : > { %v1347_v33 = vmax.f32 %v1302_v31, 0.0  ;;  %2762 = vmatmul.msk.bf16.gmra.mxu2 %vm1186_vm5, %v1592_v30 }
 0x3a3   : > { %v1482_v34 = vpop.f32.mrf.mxu1 }
 0x3a4   : > { %v1378_v35 = vpack.c.bf16 %v1347_v33, %v1346_v32  ;;  %v1483_v37 = vadd.f32 %v3498_v47, %v1482_v34 }
 0x3a6   : > { %2730 = vmatmul.msk.bf16.gmra.mxu1 %vm1186_vm5, %v1378_v35  ;;  %v1553_v40 = vmax.f32 %v1483_v37, 0.0 }
 0x3a7   : > { %v1304_v36 = vpop.f32.mrf.mxu0 }
 0x3a8   : > { %v1305_v41 = vadd.f32 %v3436_v56, %v1304_v36 }
 0x3aa   : > { %v1348_v46 = vmax.f32 %v1305_v41, 0.0 }
 0x3ab   : > { %v1484_v38 = vpop.f32.mrf.mxu1 }
 0x3ac   : > { %v1485_v39 = vadd.f32 %v3498_v47, %v1484_v38 }
 0x3ae   : > { %v1554_v42 = vmax.f32 %v1485_v39, 0.0 }
 0x3af   : > { %v1306_v43 = vpop.f32.mrf.mxu0 }
 0x3b0   : > { %v1593_v44 = vpack.c.bf16 %v1554_v42, %v1553_v40  ;;  %v1307_v45 = vadd.f32 %v3436_v56, %v1306_v43  ;;  %v3559_v40 = vld [vmem:[%s3932_s2 + $0x6] ss:$0 sm:$0xff] }
 0x3b2   : > { %v1349_v60 = vmax.f32 %v1307_v45, 0.0  ;;  %2763 = vmatmul.msk.bf16.gmra.mxu2 %vm1186_vm5, %v1593_v44 }
 0x3b3   : > { %v1487_v48 = vpop.f32.mrf.mxu1 }
 0x3b4   : > { %v1379_v49 = vpack.c.bf16 %v1349_v60, %v1348_v46  ;;  %v1488_v51 = vadd.f32 %v3498_v47, %v1487_v48 }
 0x3b6   : > { %2731 = vmatmul.msk.bf16.gmra.mxu1 %vm1186_vm5, %v1379_v49  ;;  %v1555_v53 = vmax.f32 %v1488_v51, 0.0 }
 0x3b7   : > { %v1309_v50 = vpop.f32.mrf.mxu0 }
 0x3b8   : > { %v1310_v54 = vadd.f32 %v3436_v56, %v1309_v50 }
 0x3ba   : > { %v1350_v59 = vmax.f32 %v1310_v54, 0.0 }
 0x3bb   : > { %v1489_v10 = vpop.f32.mrf.mxu1 }
 0x3bc   : > { %v1490_v52 = vadd.f32 %v3498_v47, %v1489_v10 }
 0x3be   : > { %v1556_v55 = vmax.f32 %v1490_v52, 0.0 }
 0x3bf   : > { %v1311_v20 = vpop.f32.mrf.mxu0 }
 0x3c0   : > { %v1594_v57 = vpack.c.bf16 %v1556_v55, %v1555_v53  ;;  %v1312_v58 = vadd.f32 %v3436_v56, %v1311_v20 }
 0x3c2   : > { %v1351_v61 = vmax.f32 %v1312_v58, 0.0  ;;  %2764 = vmatmul.msk.bf16.gmra.mxu2 %vm1186_vm5, %v1594_v57 }
 0x3c3   : > { %v1492_v62 = vpop.f32.mrf.mxu1 }
 0x3c4   : > { %v1380_v63 = vpack.c.bf16 %v1351_v61, %v1350_v59  ;;  %v1493_v1 = vadd.f32 %v3498_v47, %v1492_v62 }
 0x3c6   : > { %2732 = vmatmul.msk.bf16.gmra.mxu1 %vm1186_vm5, %v1380_v63  ;;  %v1557_v4 = vmax.f32 %v1493_v1, 0.0 }
 0x3c7   : > { %v1314_v0 = vpop.f32.mrf.mxu0 }
 0x3c8   : > { %v1315_v5 = vadd.f32 %v3436_v56, %v1314_v0 }
 0x3ca   : > { %v1352_v11 = vmax.f32 %v1315_v5, 0.0 }
 0x3cb   : > { %v1494_v2 = vpop.f32.mrf.mxu1 }
 0x3cc   : > { %v1495_v3 = vadd.f32 %v3498_v47, %v1494_v2 }
 0x3ce   : > { %v1558_v6 = vmax.f32 %v1495_v3, 0.0 }
 0x3cf   : > { %v1316_v7 = vpop.f32.mrf.mxu0 }
 0x3d0   : > { %v1595_v8 = vpack.c.bf16 %v1558_v6, %v1557_v4  ;;  %v1317_v9 = vadd.f32 %v3436_v56, %v1316_v7 }
 0x3d2   : > { %v1353_v12 = vmax.f32 %v1317_v9, 0.0  ;;  %2765 = vmatmul.msk.bf16.gmra.mxu2 %vm1186_vm5, %v1595_v8 }
 0x3d3   : > { %v1497_v13 = vpop.f32.mrf.mxu1 }
 0x3d4   : > { %v1381_v14 = vpack.c.bf16 %v1353_v12, %v1352_v11  ;;  %v1498_v16 = vadd.f32 %v3498_v47, %v1497_v13 }
 0x3d6   : > { %2733 = vmatmul.msk.bf16.gmra.mxu1 %vm1186_vm5, %v1381_v14  ;;  %v1559_v19 = vmax.f32 %v1498_v16, 0.0 }
 0x3d7   : > { %v1319_v15 = vpop.f32.mrf.mxu0 }
 0x3d8   : > { %v1320_v21 = vadd.f32 %v3436_v56, %v1319_v15 }
 0x3da   : > { %v1354_v26 = vmax.f32 %v1320_v21, 0.0 }
 0x3db   : > { %v1499_v17 = vpop.f32.mrf.mxu1 }
 0x3dc   : > { %v1500_v18 = vadd.f32 %v3498_v47, %v1499_v17 }
 0x3de   : > { %v1560_v22 = vmax.f32 %v1500_v18, 0.0 }
 0x3df   : > { %v1321_v23 = vpop.f32.mrf.mxu0 }
 0x3e0   : > { %v1596_v24 = vpack.c.bf16 %v1560_v22, %v1559_v19  ;;  %v1322_v25 = vadd.f32 %v3436_v56, %v1321_v23 }
 0x3e2   : > { %v1355_v27 = vmax.f32 %v1322_v25, 0.0  ;;  %2766 = vmatmul.msk.bf16.gmra.mxu2 %vm1186_vm5, %v1596_v24 }
 0x3e3   : > { %v1502_v28 = vpop.f32.mrf.mxu1 }
 0x3e4   : > { %v1382_v29 = vpack.c.bf16 %v1355_v27, %v1354_v26  ;;  %v1503_v30 = vadd.f32 %v3498_v47, %v1502_v28 }
 0x3e6   : > { %2734 = vmatmul.msk.bf16.gmra.mxu1 %vm1186_vm5, %v1382_v29  ;;  %v1561_v33 = vmax.f32 %v1503_v30, 0.0 }
 0x3eb   : > { %v1504_v31 = vpop.f32.mrf.mxu1 }
 0x3ec   : > { %v1505_v32 = vadd.f32 %v3498_v47, %v1504_v31 }
 0x3ee   : > { %v1562_v34 = vmax.f32 %v1505_v32, 0.0 }
 0x3f0   : > { %v1597_v35 = vpack.c.bf16 %v1562_v34, %v1561_v33 }
 0x3f2   : > { %2767 = vmatmul.msk.bf16.gmra.mxu2 %vm1186_vm5, %v1597_v35 }
 0x3f3   : > { %v1507_v36 = vpop.f32.mrf.mxu1 }
 0x3f4   : > { %v1508_v56 = vadd.f32 %v3498_v47, %v1507_v36 }
 0x3f6   : > { %v1563_v41 = vmax.f32 %v1508_v56, 0.0 }
 0x3fa   : > { %v1690_v37 = vpop.f32.mrf.mxu2 }
 0x3fb   : > { %v1509_v38 = vpop.f32.mrf.mxu1  ;;  %v1691_v44 = vadd.f32 %v3559_v40, %v1690_v37 }
 0x3fc   : > { %v1510_v39 = vadd.f32 %v3498_v47, %v1509_v38 }
 0x3fd   : > { %v1770_v48 = vmax.f32 %v1691_v44, 0.0 }
 0x3fe   : > { %v1564_v42 = vmax.f32 %v1510_v39, 0.0 }
 0x400   : > { %v1598_v43 = vpack.c.bf16 %v1564_v42, %v1563_v41 }
 0x402   : > { %2768 = vmatmul.msk.bf16.gmra.mxu2 %vm1186_vm5, %v1598_v43  ;;  %v1692_v45 = vpop.f32.mrf.mxu2 }
 0x403   : > { %v1512_v46 = vpop.f32.mrf.mxu1  ;;  %v1693_v60 = vadd.f32 %v3559_v40, %v1692_v45 }
 0x404   : > { %v1513_v51 = vadd.f32 %v3498_v47, %v1512_v46 }
 0x405   : > { %v1771_v49 = vmax.f32 %v1693_v60, 0.0 }
 0x406   : > { %v1565_v53 = vmax.f32 %v1513_v51, 0.0 }
 0x407   : > { %v1809_v50 = vpack.c.bf16 %v1771_v49, %v1770_v48 }
 0x409   : > { %2789 = vmatmul.msk.bf16.vlgmr.msra.gmra.mxu3 %vm755_vm4, %v1809_v50 }
 0x40b   : > { %v1514_v10 = vpop.f32.mrf.mxu1 }
 0x40c   : > { %v1515_v52 = vadd.f32 %v3498_v47, %v1514_v10 }
 0x40e   : > { %v1566_v54 = vmax.f32 %v1515_v52, 0.0 }
 0x410   : > { %v1599_v55 = vpack.c.bf16 %v1566_v54, %v1565_v53 }
 0x412   : > { %2769 = vmatmul.msk.bf16.gmra.mxu2 %vm1186_vm5, %v1599_v55 }
 0x413   : > { %v1517_v20 = vpop.f32.mrf.mxu1 }
 0x414   : > { %v1518_v58 = vadd.f32 %v3498_v47, %v1517_v20 }
 0x415   : > { %v1695_v57 = vpop.f32.mrf.mxu2 }
 0x416   : > { %v1696_v61 = vadd.f32 %v3559_v40, %v1695_v57  ;;  %v1567_v0 = vmax.f32 %v1518_v58, 0.0 }
 0x418   : > { %v1772_v3 = vmax.f32 %v1696_v61, 0.0 }
 0x41b   : > { %v1519_v59 = vpop.f32.mrf.mxu1 }
 0x41c   : > { %v1520_v62 = vadd.f32 %v3498_v47, %v1519_v59 }
 0x41d   : > { %v1697_v63 = vpop.f32.mrf.mxu2 }
 0x41e   : > { %v1568_v1 = vmax.f32 %v1520_v62, 0.0  ;;  %v1698_v2 = vadd.f32 %v3559_v40, %v1697_v63 }
 0x420   : > { %v1600_v4 = vpack.c.bf16 %v1568_v1, %v1567_v0  ;;  %v1773_v5 = vmax.f32 %v1698_v2, 0.0 }
 0x422   : > { %v1810_v6 = vpack.c.bf16 %v1773_v5, %v1772_v3  ;;  %2770 = vmatmul.msk.bf16.gmra.mxu2 %vm1186_vm5, %v1600_v4 }
 0x423   : > { %v1522_v7 = vpop.f32.mrf.mxu1 }
 0x424   : > { %2790 = vmatmul.msk.bf16.gmra.mxu3 %vm755_vm4, %v1810_v6  ;;  %v1523_v9 = vadd.f32 %v3498_v47, %v1522_v7 }
 0x425   : > { %v1700_v8 = vpop.f32.mrf.mxu2 }
 0x426   : > { %v1701_v12 = vadd.f32 %v3559_v40, %v1700_v8  ;;  %v1569_v15 = vmax.f32 %v1523_v9, 0.0 }
 0x428   : > { %v1774_v18 = vmax.f32 %v1701_v12, 0.0 }
 0x42b   : > { %v1524_v11 = vpop.f32.mrf.mxu1 }
 0x42c   : > { %v1525_v13 = vadd.f32 %v3498_v47, %v1524_v11 }
 0x42d   : > { %v1702_v14 = vpop.f32.mrf.mxu2 }
 0x42e   : > { %v1570_v16 = vmax.f32 %v1525_v13, 0.0  ;;  %v1703_v17 = vadd.f32 %v3559_v40, %v1702_v14 }
 0x430   : > { %v1601_v19 = vpack.c.bf16 %v1570_v16, %v1569_v15  ;;  %v1775_v21 = vmax.f32 %v1703_v17, 0.0 }
 0x432   : > { %v1811_v22 = vpack.c.bf16 %v1775_v21, %v1774_v18  ;;  %2771 = vmatmul.msk.bf16.gmra.mxu2 %vm1186_vm5, %v1601_v19 }
 0x433   : > { %v1527_v23 = vpop.f32.mrf.mxu1 }
 0x434   : > { %2791 = vmatmul.msk.bf16.gmra.mxu3 %vm755_vm4, %v1811_v22  ;;  %v1528_v25 = vadd.f32 %v3498_v47, %v1527_v23 }
 0x435   : > { %v1705_v24 = vpop.f32.mrf.mxu2 }
 0x436   : > { %v1706_v27 = vadd.f32 %v3559_v40, %v1705_v24  ;;  %v1571_v30 = vmax.f32 %v1528_v25, 0.0 }
 0x438   : > { %v1776_v33 = vmax.f32 %v1706_v27, 0.0 }
 0x43b   : > { %v1529_v26 = vpop.f32.mrf.mxu1 }
 0x43c   : > { %v1530_v28 = vadd.f32 %v3498_v47, %v1529_v26 }
 0x43d   : > { %v1707_v29 = vpop.f32.mrf.mxu2 }
 0x43e   : > { %v1572_v31 = vmax.f32 %v1530_v28, 0.0  ;;  %v1708_v32 = vadd.f32 %v3559_v40, %v1707_v29  ;;  %v3612_v28 = vld [vmem:[%s3932_s2 + $0x7] ss:$0 sm:$0xff] }
 0x440   : > { %v1602_v34 = vpack.c.bf16 %v1572_v31, %v1571_v30  ;;  %v1777_v35 = vmax.f32 %v1708_v32, 0.0 }
 0x442   : > { %v1812_v36 = vpack.c.bf16 %v1777_v35, %v1776_v33  ;;  %2772 = vmatmul.msk.bf16.gmra.mxu2 %vm1186_vm5, %v1602_v34 }
 0x443   : > { %v1532_v56 = vpop.f32.mrf.mxu1 }
 0x444   : > { %2792 = vmatmul.msk.bf16.gmra.mxu3 %vm755_vm4, %v1812_v36  ;;  %v1533_v38 = vadd.f32 %v3498_v47, %v1532_v56 }
 0x445   : > { %v1710_v37 = vpop.f32.mrf.mxu2 }
 0x446   : > { %v1711_v41 = vadd.f32 %v3559_v40, %v1710_v37  ;;  %v1573_v44 = vmax.f32 %v1533_v38, 0.0 }
 0x448   : > { %v1778_v60 = vmax.f32 %v1711_v41, 0.0 }
 0x44b   : > { %v1534_v39 = vpop.f32.mrf.mxu1 }
 0x44c   : > { %v1535_v42 = vadd.f32 %v3498_v47, %v1534_v39 }
 0x44d   : > { %v1712_v43 = vpop.f32.mrf.mxu2 }
 0x44e   : > { %v1574_v45 = vmax.f32 %v1535_v42, 0.0  ;;  %v1713_v46 = vadd.f32 %v3559_v40, %v1712_v43 }
 0x450   : > { %v1603_v48 = vpack.c.bf16 %v1574_v45, %v1573_v44  ;;  %v1779_v49 = vmax.f32 %v1713_v46, 0.0 }
 0x452   : > { %v1813_v50 = vpack.c.bf16 %v1779_v49, %v1778_v60  ;;  %2773 = vmatmul.msk.bf16.gmra.mxu2 %vm1186_vm5, %v1603_v48 }
 0x453   : > { %v1537_v51 = vpop.f32.mrf.mxu1 }
 0x454   : > { %2793 = vmatmul.msk.bf16.gmra.mxu3 %vm755_vm4, %v1813_v50  ;;  %v1538_v52 = vadd.f32 %v3498_v47, %v1537_v51 }
 0x455   : > { %v1715_v10 = vpop.f32.mrf.mxu2 }
 0x456   : > { %v1716_v54 = vadd.f32 %v3559_v40, %v1715_v10  ;;  %v1575_v57 = vmax.f32 %v1538_v52, 0.0 }
 0x458   : > { %v1780_v61 = vmax.f32 %v1716_v54, 0.0 }
 0x45b   : > { %v1539_v53 = vpop.f32.mrf.mxu1 }
 0x45c   : > { %v1540_v55 = vadd.f32 %v3498_v47, %v1539_v53 }
 0x45d   : > { %v1717_v20 = vpop.f32.mrf.mxu2 }
 0x45e   : > { %v1576_v58 = vmax.f32 %v1540_v55, 0.0  ;;  %v1718_v59 = vadd.f32 %v3559_v40, %v1717_v20 }
 0x460   : > { %v1604_v62 = vpack.c.bf16 %v1576_v58, %v1575_v57  ;;  %v1781_v63 = vmax.f32 %v1718_v59, 0.0 }
 0x462   : > { %v1814_v0 = vpack.c.bf16 %v1781_v63, %v1780_v61  ;;  %2774 = vmatmul.msk.bf16.gmra.mxu2 %vm1186_vm5, %v1604_v62 }
 0x463   : > { %v1542_v1 = vpop.f32.mrf.mxu1 }
 0x464   : > { %2794 = vmatmul.msk.bf16.gmra.mxu3 %vm755_vm4, %v1814_v0  ;;  %v1543_v3 = vadd.f32 %v3498_v47, %v1542_v1 }
 0x465   : > { %v1720_v2 = vpop.f32.mrf.mxu2 }
 0x466   : > { %v1721_v5 = vadd.f32 %v3559_v40, %v1720_v2  ;;  %v1577_v8 = vmax.f32 %v1543_v3, 0.0 }
 0x468   : > { %v1782_v12 = vmax.f32 %v1721_v5, 0.0 }
 0x46b   : > { %v1544_v4 = vpop.f32.mrf.mxu1 }
 0x46c   : > { %v1545_v6 = vadd.f32 %v3498_v47, %v1544_v4 }
 0x46d   : > { %v1722_v7 = vpop.f32.mrf.mxu2 }
 0x46e   : > { %v1578_v9 = vmax.f32 %v1545_v6, 0.0  ;;  %v1723_v11 = vadd.f32 %v3559_v40, %v1722_v7 }
 0x470   : > { %v1605_v13 = vpack.c.bf16 %v1578_v9, %v1577_v8  ;;  %v1783_v14 = vmax.f32 %v1723_v11, 0.0 }
 0x472   : > { %v1815_v15 = vpack.c.bf16 %v1783_v14, %v1782_v12  ;;  %2775 = vmatmul.msk.bf16.gmra.mxu2 %vm1186_vm5, %v1605_v13 }
 0x474   : > { %2795 = vmatmul.msk.bf16.gmra.mxu3 %vm755_vm4, %v1815_v15 }
 0x475   : > { %v1725_v16 = vpop.f32.mrf.mxu2 }
 0x476   : > { %v1726_v17 = vadd.f32 %v3559_v40, %v1725_v16 }
 0x478   : > { %v1784_v47 = vmax.f32 %v1726_v17, 0.0 }
 0x47d   : > { %v1727_v18 = vpop.f32.mrf.mxu2 }
 0x47e   : > { %v1728_v19 = vadd.f32 %v3559_v40, %v1727_v18 }
 0x480   : > { %v1785_v21 = vmax.f32 %v1728_v19, 0.0 }
 0x482   : > { %v1816_v22 = vpack.c.bf16 %v1785_v21, %v1784_v47 }
 0x484   : > { %2796 = vmatmul.msk.bf16.gmra.mxu3 %vm755_vm4, %v1816_v22 }
 0x485   : > { %v1730_v23 = vpop.f32.mrf.mxu2 }
 0x486   : > { %v1731_v24 = vadd.f32 %v3559_v40, %v1730_v23 }
 0x488   : > { %v1786_v29 = vmax.f32 %v1731_v24, 0.0 }
 0x48c   : > { %v1897_v25 = vpop.f32.mrf.mxu3 }
 0x48d   : > { %v1732_v26 = vpop.f32.mrf.mxu2  ;;  %v1898_v32 = vadd.f32 %v3612_v28, %v1897_v25 }
 0x48e   : > { %v1733_v27 = vadd.f32 %v3559_v40, %v1732_v26 }
 0x48f   : > { %v1977_v36 = vmax.f32 %v1898_v32, 0.0 }
 0x490   : > { %v1787_v30 = vmax.f32 %v1733_v27, 0.0 }
 0x492   : > { %v1817_v31 = vpack.c.bf16 %v1787_v30, %v1786_v29 }
 0x494   : > { %2797 = vmatmul.msk.bf16.gmra.mxu3 %vm755_vm4, %v1817_v31  ;;  %v1899_v33 = vpop.f32.mrf.mxu3 }
 0x495   : > { %v1735_v34 = vpop.f32.mrf.mxu2  ;;  %v1900_v35 = vadd.f32 %v3612_v28, %v1899_v33 }
 0x496   : > { %v1736_v38 = vadd.f32 %v3559_v40, %v1735_v34 }
 0x497   : > { %v1978_v56 = vmax.f32 %v1900_v35, 0.0 }
 0x498   : > { %v1788_v42 = vmax.f32 %v1736_v38, 0.0 }
 0x499   : > { %v2014_v37 = vpack.c.bf16 %v1978_v56, %v1977_v36 }
 0x49b   : > { %2812 = vmatmul.msk.bf16.vlgmr.msra.gmra.mxu0 %vm547_vm3, %v2014_v37 }
 0x49d   : > { %v1737_v39 = vpop.f32.mrf.mxu2 }
 0x49e   : > { %v1738_v41 = vadd.f32 %v3559_v40, %v1737_v39 }
 0x4a0   : > { %v1789_v43 = vmax.f32 %v1738_v41, 0.0 }
 0x4a2   : > { %v1818_v44 = vpack.c.bf16 %v1789_v43, %v1788_v42 }
 0x4a4   : > { %2798 = vmatmul.msk.bf16.gmra.mxu3 %vm755_vm4, %v1818_v44 }
 0x4a5   : > { %v1740_v45 = vpop.f32.mrf.mxu2 }
 0x4a6   : > { %v1741_v60 = vadd.f32 %v3559_v40, %v1740_v45 }
 0x4a7   : > { %v1902_v46 = vpop.f32.mrf.mxu3 }
 0x4a8   : > { %v1903_v49 = vadd.f32 %v3612_v28, %v1902_v46  ;;  %v1790_v10 = vmax.f32 %v1741_v60, 0.0 }
 0x4aa   : > { %v1979_v54 = vmax.f32 %v1903_v49, 0.0 }
 0x4ad   : > { %v1742_v48 = vpop.f32.mrf.mxu2 }
 0x4ae   : > { %v1743_v50 = vadd.f32 %v3559_v40, %v1742_v48 }
 0x4af   : > { %v1904_v51 = vpop.f32.mrf.mxu3 }
 0x4b0   : > { %v1791_v52 = vmax.f32 %v1743_v50, 0.0  ;;  %v1905_v53 = vadd.f32 %v3612_v28, %v1904_v51 }
 0x4b2   : > { %v1819_v55 = vpack.c.bf16 %v1791_v52, %v1790_v10  ;;  %v1980_v20 = vmax.f32 %v1905_v53, 0.0 }
 0x4b4   : > { %v2015_v57 = vpack.c.bf16 %v1980_v20, %v1979_v54  ;;  %2799 = vmatmul.msk.bf16.gmra.mxu3 %vm755_vm4, %v1819_v55 }
 0x4b5   : > { %v1745_v58 = vpop.f32.mrf.mxu2 }
 0x4b6   : > { %2813 = vmatmul.msk.bf16.gmra.mxu0 %vm547_vm3, %v2015_v57  ;;  %v1746_v61 = vadd.f32 %v3559_v40, %v1745_v58 }
 0x4b7   : > { %v1907_v59 = vpop.f32.mrf.mxu3 }
 0x4b8   : > { %v1908_v63 = vadd.f32 %v3612_v28, %v1907_v59  ;;  %v1792_v2 = vmax.f32 %v1746_v61, 0.0 }
 0x4ba   : > { %v1981_v5 = vmax.f32 %v1908_v63, 0.0 }
 0x4bd   : > { %v1747_v62 = vpop.f32.mrf.mxu2 }
 0x4be   : > { %v1748_v0 = vadd.f32 %v3559_v40, %v1747_v62 }
 0x4bf   : > { %v1909_v1 = vpop.f32.mrf.mxu3 }
 0x4c0   : > { %v1793_v3 = vmax.f32 %v1748_v0, 0.0  ;;  %v1910_v4 = vadd.f32 %v3612_v28, %v1909_v1 }
 0x4c2   : > { %v1820_v6 = vpack.c.bf16 %v1793_v3, %v1792_v2  ;;  %v1982_v7 = vmax.f32 %v1910_v4, 0.0 }
 0x4c4   : > { %v2016_v8 = vpack.c.bf16 %v1982_v7, %v1981_v5  ;;  %2800 = vmatmul.msk.bf16.gmra.mxu3 %vm755_vm4, %v1820_v6 }
 0x4c5   : > { %v1750_v9 = vpop.f32.mrf.mxu2 }
 0x4c6   : > { %2814 = vmatmul.msk.bf16.gmra.mxu0 %vm547_vm3, %v2016_v8  ;;  %v1751_v12 = vadd.f32 %v3559_v40, %v1750_v9  ;;  %v3663_v9 = vld [vmem:[%s3932_s2 + $0x8] ss:$0 sm:$0xff] }
 0x4c7   : > { %v1912_v11 = vpop.f32.mrf.mxu3 }
 0x4c8   : > { %v1913_v14 = vadd.f32 %v3612_v28, %v1912_v11  ;;  %v1794_v17 = vmax.f32 %v1751_v12, 0.0 }
 0x4ca   : > { %v1983_v47 = vmax.f32 %v1913_v14, 0.0 }
 0x4cd   : > { %v1752_v13 = vpop.f32.mrf.mxu2 }
 0x4ce   : > { %v1753_v15 = vadd.f32 %v3559_v40, %v1752_v13 }
 0x4cf   : > { %v1914_v16 = vpop.f32.mrf.mxu3 }
 0x4d0   : > { %v1795_v18 = vmax.f32 %v1753_v15, 0.0  ;;  %v1915_v19 = vadd.f32 %v3612_v28, %v1914_v16 }
 0x4d2   : > { %v1821_v21 = vpack.c.bf16 %v1795_v18, %v1794_v17  ;;  %v1984_v22 = vmax.f32 %v1915_v19, 0.0 }
 0x4d4   : > { %v2017_v23 = vpack.c.bf16 %v1984_v22, %v1983_v47  ;;  %2801 = vmatmul.msk.bf16.gmra.mxu3 %vm755_vm4, %v1821_v21 }
 0x4d5   : > { %v1755_v24 = vpop.f32.mrf.mxu2 }
 0x4d6   : > { %2815 = vmatmul.msk.bf16.gmra.mxu0 %vm547_vm3, %v2017_v23  ;;  %v1756_v26 = vadd.f32 %v3559_v40, %v1755_v24 }
 0x4d7   : > { %v1917_v25 = vpop.f32.mrf.mxu3 }
 0x4d8   : > { %v1918_v29 = vadd.f32 %v3612_v28, %v1917_v25  ;;  %v1796_v32 = vmax.f32 %v1756_v26, 0.0 }
 0x4da   : > { %v1985_v35 = vmax.f32 %v1918_v29, 0.0 }
 0x4dd   : > { %v1757_v27 = vpop.f32.mrf.mxu2 }
 0x4de   : > { %v1758_v30 = vadd.f32 %v3559_v40, %v1757_v27 }
 0x4df   : > { %v1919_v31 = vpop.f32.mrf.mxu3 }
 0x4e0   : > { %v1797_v33 = vmax.f32 %v1758_v30, 0.0  ;;  %v1920_v34 = vadd.f32 %v3612_v28, %v1919_v31 }
 0x4e2   : > { %v1822_v36 = vpack.c.bf16 %v1797_v33, %v1796_v32  ;;  %v1986_v56 = vmax.f32 %v1920_v34, 0.0 }
 0x4e4   : > { %v2018_v37 = vpack.c.bf16 %v1986_v56, %v1985_v35  ;;  %2802 = vmatmul.msk.bf16.gmra.mxu3 %vm755_vm4, %v1822_v36 }
 0x4e5   : > { %v1760_v38 = vpop.f32.mrf.mxu2 }
 0x4e6   : > { %2816 = vmatmul.msk.bf16.gmra.mxu0 %vm547_vm3, %v2018_v37  ;;  %v1761_v41 = vadd.f32 %v3559_v40, %v1760_v38 }
 0x4e7   : > { %v1922_v39 = vpop.f32.mrf.mxu3 }
 0x4e8   : > { %v1923_v43 = vadd.f32 %v3612_v28, %v1922_v39  ;;  %v1798_v46 = vmax.f32 %v1761_v41, 0.0 }
 0x4ea   : > { %v1987_v49 = vmax.f32 %v1923_v43, 0.0 }
 0x4ed   : > { %v1762_v42 = vpop.f32.mrf.mxu2 }
 0x4ee   : > { %v1763_v44 = vadd.f32 %v3559_v40, %v1762_v42 }
 0x4ef   : > { %v1924_v45 = vpop.f32.mrf.mxu3 }
 0x4f0   : > { %v1799_v60 = vmax.f32 %v1763_v44, 0.0  ;;  %v1925_v48 = vadd.f32 %v3612_v28, %v1924_v45 }
 0x4f2   : > { %v1823_v50 = vpack.c.bf16 %v1799_v60, %v1798_v46  ;;  %v1988_v51 = vmax.f32 %v1925_v48, 0.0 }
 0x4f4   : > { %v2019_v10 = vpack.c.bf16 %v1988_v51, %v1987_v49  ;;  %2803 = vmatmul.msk.bf16.gmra.mxu3 %vm755_vm4, %v1823_v50 }
 0x4f5   : > { %v1765_v52 = vpop.f32.mrf.mxu2 }
 0x4f6   : > { %2817 = vmatmul.msk.bf16.gmra.mxu0 %vm547_vm3, %v2019_v10  ;;  %v1766_v54 = vadd.f32 %v3559_v40, %v1765_v52 }
 0x4f7   : > { %v1927_v53 = vpop.f32.mrf.mxu3 }
 0x4f8   : > { %v1928_v20 = vadd.f32 %v3612_v28, %v1927_v53  ;;  %v1800_v59 = vmax.f32 %v1766_v54, 0.0 }
 0x4fa   : > { %v1989_v63 = vmax.f32 %v1928_v20, 0.0 }
 0x4fd   : > { %v1767_v55 = vpop.f32.mrf.mxu2 }
 0x4fe   : > { %v1768_v57 = vadd.f32 %v3559_v40, %v1767_v55 }
 0x4ff   : > { %v1929_v58 = vpop.f32.mrf.mxu3 }
 0x500   : > { %v1801_v61 = vmax.f32 %v1768_v57, 0.0  ;;  %v1930_v62 = vadd.f32 %v3612_v28, %v1929_v58 }
 0x502   : > { %v1824_v0 = vpack.c.bf16 %v1801_v61, %v1800_v59  ;;  %v1990_v1 = vmax.f32 %v1930_v62, 0.0 }
 0x504   : > { %v2020_v2 = vpack.c.bf16 %v1990_v1, %v1989_v63  ;;  %2804 = vmatmul.msk.bf16.gmra.mxu3 %vm755_vm4, %v1824_v0 }
 0x506   : > { %2818 = vmatmul.msk.bf16.gmra.mxu0 %vm547_vm3, %v2020_v2 }
 0x507   : > { %v1932_v3 = vpop.f32.mrf.mxu3 }
 0x508   : > { %v1933_v4 = vadd.f32 %v3612_v28, %v1932_v3 }
 0x50a   : > { %v1991_v6 = vmax.f32 %v1933_v4, 0.0 }
 0x50f   : > { %v1934_v5 = vpop.f32.mrf.mxu3 }
 0x510   : > { %v1935_v40 = vadd.f32 %v3612_v28, %v1934_v5 }
 0x512   : > { %v1992_v7 = vmax.f32 %v1935_v40, 0.0 }
 0x514   : > { %v2021_v8 = vpack.c.bf16 %v1992_v7, %v1991_v6 }
 0x516   : > { %2819 = vmatmul.msk.bf16.gmra.mxu0 %vm547_vm3, %v2021_v8 }
 0x517   : > { %v1937_v11 = vpop.f32.mrf.mxu3 }
 0x518   : > { %v2096_v12 = vpop.f32.mrf.mxu0  ;;  %v1938_v14 = vadd.f32 %v3612_v28, %v1937_v11 }
 0x519   : > { %v2097_v13 = vadd.f32 %v3663_v9, %v2096_v12 }
 0x51a   : > { %v1993_v19 = vmax.f32 %v1938_v14, 0.0 }
 0x51b   : > { %2177 = vst.msk [vmem:[%s3667_s29] sm:$0xff] %vm2176_vm6, %v2097_v13 }
 0x51f   : > { %v1939_v15 = vpop.f32.mrf.mxu3 }
 0x520   : > { %v1940_v16 = vadd.f32 %v3612_v28, %v1939_v15  ;;  %v2098_v17 = vpop.f32.mrf.mxu0 }
 0x521   : > { %v2099_v18 = vadd.f32 %v3663_v9, %v2098_v17 }
 0x522   : > { %v1994_v47 = vmax.f32 %v1940_v16, 0.0 }
 0x523   : > { %2178 = vst.msk [vmem:[%s3667_s29 + $0x8] sm:$0xff] %vm2176_vm6, %v2099_v18 }
 0x524   : > { %v2022_v21 = vpack.c.bf16 %v1994_v47, %v1993_v19 }
 0x526   : > { %2820 = vmatmul.msk.bf16.gmra.mxu0 %vm547_vm3, %v2022_v21 }
 0x527   : > { %v1942_v22 = vpop.f32.mrf.mxu3 }
 0x528   : > { %v1943_v23 = vadd.f32 %v3612_v28, %v1942_v22 }
 0x52a   : > { %v1995_v26 = vmax.f32 %v1943_v23, 0.0 }
 0x52f   : > { %v1944_v24 = vpop.f32.mrf.mxu3 }
 0x530   : > { %v1945_v25 = vadd.f32 %v3612_v28, %v1944_v24 }
 0x532   : > { %v1996_v27 = vmax.f32 %v1945_v25, 0.0 }
 0x533   : > { %v2101_v29 = vpop.f32.mrf.mxu0 }
 0x534   : > { %v2023_v30 = vpack.c.bf16 %v1996_v27, %v1995_v26  ;;  %v2102_v31 = vadd.f32 %v3663_v9, %v2101_v29 }
 0x536   : > { %2179 = vst.msk [vmem:[%s3667_s29 + $0x10] sm:$0xff] %vm2176_vm6, %v2102_v31  ;;  %2821 = vmatmul.msk.bf16.gmra.mxu0 %vm547_vm3, %v2023_v30 }
 0x537   : > { %v1947_v32 = vpop.f32.mrf.mxu3 }
 0x538   : > { %v1948_v35 = vadd.f32 %v3612_v28, %v1947_v32 }
 0x53a   : > { %v1997_v37 = vmax.f32 %v1948_v35, 0.0 }
 0x53b   : > { %v2103_v33 = vpop.f32.mrf.mxu0 }
 0x53c   : > { %v2104_v34 = vadd.f32 %v3663_v9, %v2103_v33 }
 0x53e   : > { %2180 = vst.msk [vmem:[%s3667_s29 + $0x18] sm:$0xff] %vm2176_vm6, %v2104_v34 }
 0x53f   : > { %v1949_v36 = vpop.f32.mrf.mxu3 }
 0x540   : > { %v1950_v56 = vadd.f32 %v3612_v28, %v1949_v36 }
 0x542   : > { %v1998_v38 = vmax.f32 %v1950_v56, 0.0 }
 0x543   : > { %v2106_v39 = vpop.f32.mrf.mxu0 }
 0x544   : > { %v2024_v41 = vpack.c.bf16 %v1998_v38, %v1997_v37  ;;  %v2107_v42 = vadd.f32 %v3663_v9, %v2106_v39 }
 0x546   : > { %2181 = vst.msk [vmem:[%s3667_s29 + $0x20] sm:$0xff] %vm2176_vm6, %v2107_v42  ;;  %2822 = vmatmul.msk.bf16.gmra.mxu0 %vm547_vm3, %v2024_v41 }
 0x547   : > { %v1952_v43 = vpop.f32.mrf.mxu3 }
 0x548   : > { %v1953_v46 = vadd.f32 %v3612_v28, %v1952_v43 }
 0x54a   : > { %v1999_v49 = vmax.f32 %v1953_v46, 0.0 }
 0x54b   : > { %v2108_v44 = vpop.f32.mrf.mxu0 }
 0x54c   : > { %v2109_v45 = vadd.f32 %v3663_v9, %v2108_v44 }
 0x54e   : > { %2182 = vst.msk [vmem:[%s3667_s29 + $0x28] sm:$0xff] %vm2176_vm6, %v2109_v45 }
 0x54f   : > { %v1954_v60 = vpop.f32.mrf.mxu3 }
 0x550   : > { %v1955_v48 = vadd.f32 %v3612_v28, %v1954_v60 }
 0x552   : > { %v2000_v50 = vmax.f32 %v1955_v48, 0.0 }
 0x553   : > { %v2111_v51 = vpop.f32.mrf.mxu0 }
 0x554   : > { %v2025_v10 = vpack.c.bf16 %v2000_v50, %v1999_v49  ;;  %v2112_v52 = vadd.f32 %v3663_v9, %v2111_v51 }
 0x556   : > { %2183 = vst.msk [vmem:[%s3667_s29 + $0x30] sm:$0xff] %vm2176_vm6, %v2112_v52  ;;  %2823 = vmatmul.msk.bf16.gmra.mxu0 %vm547_vm3, %v2025_v10 }
 0x557   : > { %v1957_v53 = vpop.f32.mrf.mxu3 }
 0x558   : > { %v1958_v20 = vadd.f32 %v3612_v28, %v1957_v53 }
 0x55a   : > { %v2001_v59 = vmax.f32 %v1958_v20, 0.0 }
 0x55b   : > { %v2113_v54 = vpop.f32.mrf.mxu0 }
 0x55c   : > { %v2114_v55 = vadd.f32 %v3663_v9, %v2113_v54 }
 0x55e   : > { %2184 = vst.msk [vmem:[%s3667_s29 + $0x38] sm:$0xff] %vm2176_vm6, %v2114_v55 }
 0x55f   : > { %v1959_v57 = vpop.f32.mrf.mxu3 }
 0x560   : > { %v1960_v58 = vadd.f32 %v3612_v28, %v1959_v57 }
 0x562   : > { %v2002_v61 = vmax.f32 %v1960_v58, 0.0 }
 0x563   : > { %v2116_v62 = vpop.f32.mrf.mxu0 }
 0x564   : > { %v2026_v63 = vpack.c.bf16 %v2002_v61, %v2001_v59  ;;  %v2117_v0 = vadd.f32 %v3663_v9, %v2116_v62 }
 0x566   : > { %2185 = vst.msk [vmem:[%s3667_s29 + $0x40] sm:$0xff] %vm2176_vm6, %v2117_v0  ;;  %2824 = vmatmul.msk.bf16.gmra.mxu0 %vm547_vm3, %v2026_v63 }
 0x567   : > { %v1962_v1 = vpop.f32.mrf.mxu3 }
 0x568   : > { %v1963_v4 = vadd.f32 %v3612_v28, %v1962_v1 }
 0x56a   : > { %v2003_v6 = vmax.f32 %v1963_v4, 0.0 }
 0x56b   : > { %v2118_v2 = vpop.f32.mrf.mxu0 }
 0x56c   : > { %v2119_v3 = vadd.f32 %v3663_v9, %v2118_v2 }
 0x56e   : > { %2186 = vst.msk [vmem:[%s3667_s29 + $0x48] sm:$0xff] %vm2176_vm6, %v2119_v3 }
 0x56f   : > { %v1964_v5 = vpop.f32.mrf.mxu3 }
 0x570   : > { %v1965_v40 = vadd.f32 %v3612_v28, %v1964_v5 }
 0x572   : > { %v2004_v7 = vmax.f32 %v1965_v40, 0.0 }
 0x573   : > { %v2121_v8 = vpop.f32.mrf.mxu0 }
 0x574   : > { %v2027_v11 = vpack.c.bf16 %v2004_v7, %v2003_v6  ;;  %v2122_v12 = vadd.f32 %v3663_v9, %v2121_v8 }
 0x576   : > { %2187 = vst.msk [vmem:[%s3667_s29 + $0x50] sm:$0xff] %vm2176_vm6, %v2122_v12  ;;  %2825 = vmatmul.msk.bf16.gmra.mxu0 %vm547_vm3, %v2027_v11 }
 0x577   : > { %v1967_v13 = vpop.f32.mrf.mxu3 }
 0x578   : > { %v1968_v16 = vadd.f32 %v3612_v28, %v1967_v13 }
 0x57a   : > { %v2005_v19 = vmax.f32 %v1968_v16, 0.0 }
 0x57b   : > { %v2123_v14 = vpop.f32.mrf.mxu0 }
 0x57c   : > { %v2124_v15 = vadd.f32 %v3663_v9, %v2123_v14 }
 0x57e   : > { %2188 = vst.msk [vmem:[%s3667_s29 + $0x58] sm:$0xff] %vm2176_vm6, %v2124_v15 }
 0x57f   : > { %v1969_v17 = vpop.f32.mrf.mxu3 }
 0x580   : > { %v1970_v18 = vadd.f32 %v3612_v28, %v1969_v17 }
 0x582   : > { %v2006_v47 = vmax.f32 %v1970_v18, 0.0 }
 0x583   : > { %v2126_v21 = vpop.f32.mrf.mxu0 }
 0x584   : > { %v2028_v22 = vpack.c.bf16 %v2006_v47, %v2005_v19  ;;  %v2127_v23 = vadd.f32 %v3663_v9, %v2126_v21 }
 0x586   : > { %2189 = vst.msk [vmem:[%s3667_s29 + $0x60] sm:$0xff] %vm2176_vm6, %v2127_v23  ;;  %2826 = vmatmul.msk.bf16.gmra.mxu0 %vm547_vm3, %v2028_v22 }
 0x587   : > { %v1972_v24 = vpop.f32.mrf.mxu3 }
 0x588   : > { %v1973_v27 = vadd.f32 %v3612_v28, %v1972_v24 }
 0x58a   : > { %v2007_v31 = vmax.f32 %v1973_v27, 0.0 }
 0x58b   : > { %v2128_v25 = vpop.f32.mrf.mxu0 }
 0x58c   : > { %v2129_v26 = vadd.f32 %v3663_v9, %v2128_v25 }
 0x58e   : > { %2190 = vst.msk [vmem:[%s3667_s29 + $0x68] sm:$0xff] %vm2176_vm6, %v2129_v26 }
 0x58f   : > { %v1974_v29 = vpop.f32.mrf.mxu3 }
 0x590   : > { %v1975_v30 = vadd.f32 %v3612_v28, %v1974_v29 }
 0x592   : > { %v2008_v32 = vmax.f32 %v1975_v30, 0.0 }
 0x593   : > { %v2131_v33 = vpop.f32.mrf.mxu0 }
 0x594   : > { %v2029_v34 = vpack.c.bf16 %v2008_v32, %v2007_v31  ;;  %v2132_v35 = vadd.f32 %v3663_v9, %v2131_v33 }
 0x596   : > { %2191 = vst.msk [vmem:[%s3667_s29 + $0x70] sm:$0xff] %vm2176_vm6, %v2132_v35  ;;  %2827 = vmatmul.msk.bf16.gmra.mxu0 %vm547_vm3, %v2029_v34 }
 0x59b   : > { %v2133_v36 = vpop.f32.mrf.mxu0 }
 0x59c   : > { %v2134_v56 = vadd.f32 %v3663_v9, %v2133_v36 }
 0x59e   : > { %2192 = vst.msk [vmem:[%s3667_s29 + $0x78] sm:$0xff] %vm2176_vm6, %v2134_v56 }
 0x5a3   : > { %v2136_v28 = vpop.f32.mrf.mxu0 }
 0x5a4   : > { %v2137_v37 = vadd.f32 %v3663_v9, %v2136_v28 }
 0x5a6   : > { %2193 = vst.msk [vmem:[%s3667_s29 + $0x80] sm:$0xff] %vm2176_vm6, %v2137_v37 }
 0x5ab   : > { %v2138_v38 = vpop.f32.mrf.mxu0 }
 0x5ac   : > { %v2139_v39 = vadd.f32 %v3663_v9, %v2138_v38 }
 0x5ae   : > { %2194 = vst.msk [vmem:[%s3667_s29 + $0x88] sm:$0xff] %vm2176_vm6, %v2139_v39 }
 0x5b3   : > { %v2141_v41 = vpop.f32.mrf.mxu0 }
 0x5b4   : > { %v2142_v42 = vadd.f32 %v3663_v9, %v2141_v41 }
 0x5b6   : > { %2195 = vst.msk [vmem:[%s3667_s29 + $0x90] sm:$0xff] %vm2176_vm6, %v2142_v42 }
 0x5bb   : > { %v2143_v43 = vpop.f32.mrf.mxu0 }
 0x5bc   : > { %v2144_v44 = vadd.f32 %v3663_v9, %v2143_v43 }
 0x5be   : > { %2196 = vst.msk [vmem:[%s3667_s29 + $0x98] sm:$0xff] %vm2176_vm6, %v2144_v44 }
 0x5c3   : > { %v2146_v45 = vpop.f32.mrf.mxu0 }
 0x5c4   : > { %v2147_v46 = vadd.f32 %v3663_v9, %v2146_v45 }
 0x5c6   : > { %2197 = vst.msk [vmem:[%s3667_s29 + $0xa0] sm:$0xff] %vm2176_vm6, %v2147_v46 }
 0x5cb   : > { %v2148_v60 = vpop.f32.mrf.mxu0 }
 0x5cc   : > { %v2149_v48 = vadd.f32 %v3663_v9, %v2148_v60 }
 0x5ce   : > { %2198 = vst.msk [vmem:[%s3667_s29 + $0xa8] sm:$0xff] %vm2176_vm6, %v2149_v48 }
 0x5d3   : > { %v2151_v49 = vpop.f32.mrf.mxu0 }
 0x5d4   : > { %v2152_v50 = vadd.f32 %v3663_v9, %v2151_v49 }
 0x5d6   : > { %2199 = vst.msk [vmem:[%s3667_s29 + $0xb0] sm:$0xff] %vm2176_vm6, %v2152_v50 }
 0x5db   : > { %v2153_v51 = vpop.f32.mrf.mxu0 }
 0x5dc   : > { %v2154_v10 = vadd.f32 %v3663_v9, %v2153_v51 }
 0x5de   : > { %2200 = vst.msk [vmem:[%s3667_s29 + $0xb8] sm:$0xff] %vm2176_vm6, %v2154_v10 }
 0x5e3   : > { %v2156_v52 = vpop.f32.mrf.mxu0 }
 0x5e4   : > { %v2157_v53 = vadd.f32 %v3663_v9, %v2156_v52 }
 0x5e6   : > { %2201 = vst.msk [vmem:[%s3667_s29 + $0xc0] sm:$0xff] %vm2176_vm6, %v2157_v53 }
 0x5eb   : > { %v2158_v54 = vpop.f32.mrf.mxu0 }
 0x5ec   : > { %v2159_v55 = vadd.f32 %v3663_v9, %v2158_v54 }
 0x5ee   : > { %2202 = vst.msk [vmem:[%s3667_s29 + $0xc8] sm:$0xff] %vm2176_vm6, %v2159_v55 }
 0x5f3   : > { %v2161_v20 = vpop.f32.mrf.mxu0 }
 0x5f4   : > { %v2162_v57 = vadd.f32 %v3663_v9, %v2161_v20 }
 0x5f6   : > { %2203 = vst.msk [vmem:[%s3667_s29 + $0xd0] sm:$0xff] %vm2176_vm6, %v2162_v57 }
 0x5fb   : > { %v2163_v58 = vpop.f32.mrf.mxu0 }
 0x5fc   : > { %v2164_v59 = vadd.f32 %v3663_v9, %v2163_v58 }
 0x5fe   : > { %2204 = vst.msk [vmem:[%s3667_s29 + $0xd8] sm:$0xff] %vm2176_vm6, %v2164_v59 }
 0x603   : > { %v2166_v61 = vpop.f32.mrf.mxu0 }
 0x604   : > { %v2167_v62 = vadd.f32 %v3663_v9, %v2166_v61 }
 0x606   : > { %2205 = vst.msk [vmem:[%s3667_s29 + $0xe0] sm:$0xff] %vm2176_vm6, %v2167_v62 }
 0x60b   : > { %v2168_v63 = vpop.f32.mrf.mxu0 }
 0x60c   : > { %v2169_v0 = vadd.f32 %v3663_v9, %v2168_v63 }
 0x60e   : > { %2206 = vst.msk [vmem:[%s3667_s29 + $0xe8] sm:$0xff] %vm2176_vm6, %v2169_v0 }
 0x613   : > { %v2171_v1 = vpop.f32.mrf.mxu0 }
 0x614   : > { %v2172_v2 = vadd.f32 %v3663_v9, %v2171_v1 }
 0x616   : > { %2207 = vst.msk [vmem:[%s3667_s29 + $0xf0] sm:$0xff] %vm2176_vm6, %v2172_v2 }
 0x61a   : > { %2215 = sbr.rel (!%p3103_p4) target bundleno = 1631 (0x65f), region = 36 }
 0x61b   : > { %v2173_v3 = vpop.f32.mrf.mxu0 }
 0x61c   : > { %v2174_v4 = vadd.f32 %v3663_v9, %v2173_v3 }
 0x61e   : > { %2208 = vst.msk [vmem:[%s3667_s29 + $0xf8] sm:$0xff] %vm2176_vm6, %v2174_v4 }
 0x61f   : > { %s3944_s12 = smov (!%p2218_p8, %s2217_s12), 32 }
 0x620   : > { %s2830_s7 = sshll.u32 %s3944_s12, 3 }
 0x621   : > { %p2833_p9 = scmp.eq.s32.totalorder %s2830_s7, 0 }
 0x622   : > { %s3801_s8 = sshrl.u32 (!%p2833_p9), %s3944_s12, 5 }
 0x623   : > { %2226 = sbr.rel (%p2833_p9) target bundleno = 1631 (0x65f), region = 40  ;;  %p2834_p10 = scmp.le.s32.totalorder (!%p2833_p9), %s3801_s8, 0 }
 0x628   : > { %2505 = sbr.rel (%p2834_p10) target bundleno = 1614 (0x64e), region = 132  ;;  %s3935_s15 = smov (!%p2834_p10), %s3795_s6 }
 0x629   : > { %s3936_s20 = smov (!%p2834_p10), %s3667_s29  ;;  %s3810_s23 = smov (!%p2834_p10), 0  }
 0x62a   : > { %s3812_s9 = smov (!%p2834_p10), 0  }
 0x62d LB: >> { %v2351_v9 = vld [vmem:[%s3031_s20] sm:$0xff]  ;;  %v2353_v5 = vld [vmem:[%s3031_s20 + $0x8] sm:$0xff]  ;;  %v2355_v40 = vld [vmem:[%s3031_s20 + $0x10] sm:$0xff]  ;;  %s2415_s10 = sadd.s32 1, %s3035_s23  ;;  %s2345_s9 = sadd.s32 1, %s3039_s9   ;;  %s3039_s9 = sphi %s3812_s9, %s2345_s9   ;;  %s3035_s23 = sphi %s3810_s23, %s3939_s23   ;;  %s3031_s20 = sphi %s3936_s20, %s3938_s20   ;;  %s3027_s15 = sphi %s3935_s15, %s3937_s15  }
 0x62e   : >> { %2352 = vst [vmem:[%s3027_s15] sm:$0xff] %v2351_v9  ;;  %v2357_v6 = vld [vmem:[%s3031_s20 + $0x18] sm:$0xff]  ;;  %p2416_p11 = scmp.ge.s32.totalorder %s2415_s10, %s3801_s8  ;;  %v2359_v7 = vld [vmem:[%s3031_s20 + $0x20] sm:$0xff]  ;;  %v2361_v8 = vld [vmem:[%s3031_s20 + $0x28] sm:$0xff]  ;;  %p2344_p12 = scmp.ge.s32.totalorder %s2345_s9, %s3801_s8 }
 0x62f   : >> { %2354 = vst [vmem:[%s3027_s15 + $0x8] sm:$0xff] %v2353_v5  ;;  %v2363_v11 = vld [vmem:[%s3031_s20 + $0x30] sm:$0xff]  ;;  %v2365_v12 = vld [vmem:[%s3031_s20 + $0x38] sm:$0xff]  ;;  %v2367_v13 = vld [vmem:[%s3031_s20 + $0x40] sm:$0xff] }
 0x630   : >> { %2356 = vst [vmem:[%s3027_s15 + $0x10] sm:$0xff] %v2355_v40  ;;  %s3946_s10 = smov (%p2416_p11, %s2415_s10), 0  ;;  %v2369_v14 = vld [vmem:[%s3031_s20 + $0x48] sm:$0xff]  ;;  %v2371_v15 = vld [vmem:[%s3031_s20 + $0x50] sm:$0xff]  ;;  %v2373_v16 = vld [vmem:[%s3031_s20 + $0x58] sm:$0xff] }
 0x631   : >> { %2358 = vst [vmem:[%s3027_s15 + $0x18] sm:$0xff] %v2357_v6  ;;  %s2835_s11 = sshll.u32 %s3946_s10, 8  ;;  %v2375_v17 = vld [vmem:[%s3031_s20 + $0x60] sm:$0xff]  ;;  %v2377_v18 = vld [vmem:[%s3031_s20 + $0x68] sm:$0xff]  ;;  %v2379_v19 = vld [vmem:[%s3031_s20 + $0x70] sm:$0xff]  ;;  %s3939_s23 = smov %s3946_s10 }
 0x632   : >> { %2360 = vst [vmem:[%s3027_s15 + $0x20] sm:$0xff] %v2359_v7  ;;  %s3844_s14 = scalar_lea.vmem %s3667_s29, %s2835_s11 [#allocation3]   ;;  %s3847_s17 = scalar_lea.vmem %s3795_s6, %s2835_s11   ;;  %v2381_v47 = vld [vmem:[%s3031_s20 + $0x78] sm:$0xff]  ;;  %v2383_v21 = vld [vmem:[%s3031_s20 + $0x80] sm:$0xff]  ;;  %v2385_v22 = vld [vmem:[%s3031_s20 + $0x88] sm:$0xff] }
 0x633   : >> { %2362 = vst [vmem:[%s3027_s15 + $0x28] sm:$0xff] %v2361_v8  ;;  %v2387_v23 = vld [vmem:[%s3031_s20 + $0x90] sm:$0xff]  ;;  %v2389_v24 = vld [vmem:[%s3031_s20 + $0x98] sm:$0xff]  ;;  %v2391_v25 = vld [vmem:[%s3031_s20 + $0xa0] sm:$0xff] }
 0x634   : >> { %2364 = vst [vmem:[%s3027_s15 + $0x30] sm:$0xff] %v2363_v11  ;;  %v2393_v26 = vld [vmem:[%s3031_s20 + $0xa8] sm:$0xff]  ;;  %v2395_v27 = vld [vmem:[%s3031_s20 + $0xb0] sm:$0xff]  ;;  %v2397_v29 = vld [vmem:[%s3031_s20 + $0xb8] sm:$0xff] }
 0x635   : >> { %2366 = vst [vmem:[%s3027_s15 + $0x38] sm:$0xff] %v2365_v12  ;;  %v2399_v30 = vld [vmem:[%s3031_s20 + $0xc0] sm:$0xff]  ;;  %v2401_v31 = vld [vmem:[%s3031_s20 + $0xc8] sm:$0xff]  ;;  %v2403_v32 = vld [vmem:[%s3031_s20 + $0xd0] sm:$0xff] }
 0x636   : >> { %2368 = vst [vmem:[%s3027_s15 + $0x40] sm:$0xff] %v2367_v13  ;;  %v2405_v33 = vld [vmem:[%s3031_s20 + $0xd8] sm:$0xff]  ;;  %v2407_v34 = vld [vmem:[%s3031_s20 + $0xe0] sm:$0xff]  ;;  %v2409_v35 = vld [vmem:[%s3031_s20 + $0xe8] sm:$0xff] }
 0x637   : >> { %2370 = vst [vmem:[%s3027_s15 + $0x48] sm:$0xff] %v2369_v14  ;;  %v2411_v36 = vld [vmem:[%s3031_s20 + $0xf0] sm:$0xff]  ;;  %v2413_v56 = vld [vmem:[%s3031_s20 + $0xf8] sm:$0xff]  ;;  %s3938_s20 = smov %s3844_s14 }
 0x638   : >> { %2372 = vst [vmem:[%s3027_s15 + $0x50] sm:$0xff] %v2371_v15 }
 0x639   : >> { %2374 = vst [vmem:[%s3027_s15 + $0x58] sm:$0xff] %v2373_v16 }
 0x63a   : >> { %2376 = vst [vmem:[%s3027_s15 + $0x60] sm:$0xff] %v2375_v17 }
 0x63b   : >> { %2378 = vst [vmem:[%s3027_s15 + $0x68] sm:$0xff] %v2377_v18 }
 0x63c   : >> { %2380 = vst [vmem:[%s3027_s15 + $0x70] sm:$0xff] %v2379_v19 }
 0x63d   : >> { %2382 = vst [vmem:[%s3027_s15 + $0x78] sm:$0xff] %v2381_v47 }
 0x63e   : >> { %2384 = vst [vmem:[%s3027_s15 + $0x80] sm:$0xff] %v2383_v21 }
 0x63f   : >> { %2386 = vst [vmem:[%s3027_s15 + $0x88] sm:$0xff] %v2385_v22 }
 0x640   : >> { %2388 = vst [vmem:[%s3027_s15 + $0x90] sm:$0xff] %v2387_v23 }
 0x641   : >> { %2390 = vst [vmem:[%s3027_s15 + $0x98] sm:$0xff] %v2389_v24 }
 0x642   : >> { %2392 = vst [vmem:[%s3027_s15 + $0xa0] sm:$0xff] %v2391_v25 }
 0x643   : >> { %2394 = vst [vmem:[%s3027_s15 + $0xa8] sm:$0xff] %v2393_v26 }
 0x644   : >> { %2396 = vst [vmem:[%s3027_s15 + $0xb0] sm:$0xff] %v2395_v27 }
 0x645   : >> { %2398 = vst [vmem:[%s3027_s15 + $0xb8] sm:$0xff] %v2397_v29 }
 0x646   : >> { %2400 = vst [vmem:[%s3027_s15 + $0xc0] sm:$0xff] %v2399_v30 }
 0x647   : >> { %2402 = vst [vmem:[%s3027_s15 + $0xc8] sm:$0xff] %v2401_v31 }
 0x648   : >> { %2404 = vst [vmem:[%s3027_s15 + $0xd0] sm:$0xff] %v2403_v32 }
 0x649   : >> { %2406 = vst [vmem:[%s3027_s15 + $0xd8] sm:$0xff] %v2405_v33  ;;  %2347 = sbr.rel (!%p2344_p12) target bundleno = 1581 (0x62d), region = 138 }
 0x64a   : >> { %2408 = vst [vmem:[%s3027_s15 + $0xe0] sm:$0xff] %v2407_v34 }
 0x64b   : >> { %2410 = vst [vmem:[%s3027_s15 + $0xe8] sm:$0xff] %v2409_v35 }
 0x64c   : >> { %2412 = vst [vmem:[%s3027_s15 + $0xf0] sm:$0xff] %v2411_v36 }
 0x64d   : >> { %2414 = vst [vmem:[%s3027_s15 + $0xf8] sm:$0xff] %v2413_v56  ;;  %s3937_s15 = smov %s3847_s17 }
 0x64e PF: > { %s3912_s18 = sand.u32 31, %s3944_s12   ;;  %s2866_s21 = sshll.u32 %s3801_s8, 8 }
 0x64f   : > { %s2426_s22 = scalar_lea.vmem %s3667_s29, %s2866_s21 [#allocation3]   ;;  %s2428_s24 = scalar_lea.vmem %s3795_s6, %s2866_s21  }
 0x650   : > { %p2840_p13 = scmp.le.s32.totalorder %s3912_s18, 0 }
 0x651   : > { %s3041_s25 = smov (!%p2840_p13), %s2428_s24   ;;  %s3045_s26 = smov (!%p2840_p13), %s2426_s22  }
 0x652   : > { %2519 = sbr.rel (%p2840_p13) target bundleno = 1631 (0x65f), region = 143  ;;  %s3049_s27 = smov (!%p2840_p13), 0  }
 0x653   : > { %s3053_s28 = smov (!%p2840_p13), 0  }
 0x657 LB: >> { %v2438_v28 = vld [vmem:[%s3047_s26] sm:$0xff]  ;;  %s2440_s12 = sadd.s32 1, %s3051_s27  ;;  %s2432_s28 = sadd.s32 1, %s3055_s28   ;;  %s3055_s28 = sphi %s3053_s28, %s2432_s28   ;;  %s3051_s27 = sphi %s3049_s27, %s3050_s27   ;;  %s3047_s26 = sphi %s3045_s26, %s2445_s26   ;;  %s3043_s25 = sphi %s3041_s25, %s2446_s25  }
 0x658   : >> { %2439 = vst [vmem:[%s3043_s25] sm:$0xff] %v2438_v28  ;;  %p2441_p0 = scmp.ge.s32.totalorder %s2440_s12, %s3912_s18  ;;  %p2431_p1 = scmp.ge.s32.totalorder %s2432_s28, %s3912_s18 }
 0x65a   : >> { %s3948_s12 = smov (%p2441_p0, %s2440_s12), 0  ;;  %2434 = sbr.rel (!%p2431_p1) target bundleno = 1623 (0x657), region = 149 }
 0x65b   : >> { %s2841_s29 = sshll.u32 %s3948_s12, 3  ;;  %s3050_s27 = smov %s3948_s12  }
 0x65c   : >> { %s2445_s26 = scalar_lea.vmem %s2426_s22, %s2841_s29 [#allocation3]   ;;  %s2446_s25 = scalar_lea.vmem %s2428_s24, %s2841_s29  }
 0x65f PF: > { %p10_p2 = scmp.ge.s32.totalorder %s3093_s16, 4   ;;  %s3940_s12 = smov %s3019_s13 }
 0x660   : > { %s3941_s13 = smov %s3101_s19  ;;  %s3942_s14 = smov %s3093_s16 }
 0x661   :  { %12 = sbr.rel (!%p10_p2) target bundleno = 2 (0x2), region = 160 }

</bundles_post_ra>
